<compile_context>
chip_gen: v7x
topology: tpu7x:2x2x1
jax: 0.10.0
libtpu: 0.0.40
codegen_flags: <defaults>
</compile_context>

<pallas_src>
import jax
import jax.numpy as jnp
from jax.experimental import pallas as pl
from jax.experimental.pallas import tpu as pltpu


def _round_up(n, m):
    return (n + m - 1) // m * m


# ---------------------------------------------------------------------------
# Fused kernel: per-chunk x-projection + sequential recurrence + fused decoder.
# ---------------------------------------------------------------------------
def _make_fused_rnn_kernel(T, rem, n_chunks, unroll, compute_dtype):
    def kernel(x_ref, wx_ref, b_ref, wh_ref, h0_ref, wd_ref, bd_ref,
               hs_ref, y_ref, pre_s, h_s):
        c = pl.program_id(1)  # time-chunk axis (sequential / "arbitrary")

        # Load the initial hidden state for this batch tile once per tile.
        @pl.when(c == 0)
        def _():
            h_s[...] = h0_ref[...]

        Tb, Bt, Ip = x_ref.shape
        Hp = wh_ref.shape[0]

        # ---- Fused x-projection for the whole chunk: one (T*Bt,Ip)@(Ip,Hp) matmul.
        x2d = x_ref[...].reshape(Tb * Bt, Ip)
        pre = (jnp.dot(x2d, wx_ref[...], preferred_element_type=jnp.float32)
               + b_ref[...])
        pre_s[...] = pre.reshape(Tb, Bt, Hp)

        wh = wh_ref[...]  # W_h VMEM-resident, reused across all chunk timesteps.

        def run_steps(n_steps):
            def step(t, h):
                h_new = jnp.tanh(
                    pre_s[t]
                    + jnp.dot(h.astype(compute_dtype), wh,
                              preferred_element_type=jnp.float32))
                hs_ref[t] = h_new
                return h_new
            h_fin = jax.lax.fori_loop(0, n_steps, step, h_s[...],
                                      unroll=max(1, min(n_steps, unroll)))
            h_s[...] = h_fin

        if rem == T:
            # Every chunk is full: single unconditional path.
            run_steps(T)
        else:
            # Remainder chunk only runs its real timesteps (no dead serial steps).
            @pl.when(c != n_chunks - 1)
            def _():
                run_steps(T)

            @pl.when(c == n_chunks - 1)
            def _():
                run_steps(rem)

        # ---- Fused decoder: after the last chunk, h_s holds h_{S-1} exactly.
        @pl.when(c == n_chunks - 1)
        def _():
            y_ref[...] = (
                jnp.dot(h_s[...].astype(compute_dtype), wd_ref[...],
                        preferred_element_type=jnp.float32)
                + bd_ref[...])

    return kernel


def rnn_forward(x, h0, w_x, w_h, b, w_d, b_d, *, chunk=None, unroll=8,
                matmul_dtype=jnp.float32, single_buffer_weights=True):
    """x: (S,B,I), h0: (B,H), w_x: (I,H), w_h: (H,H), b: (H,),
    w_d: (H,O), b_d: (O,)  ->  (hidden_states (S,B,H), logits (B,O))."""
    S, B, I = x.shape
    H = h0.shape[1]
    O = w_d.shape[1]
    f32 = jnp.float32
    cd = matmul_dtype
    itm = jnp.dtype(cd).itemsize

    # ---- (8,128)-aligned padded shapes. Padded hidden lanes stay exactly 0
    #      through the recurrence (zero weight/bias columns); padded batch rows
    #      and padded timesteps are sliced away before use.
    Ip = _round_up(I, 128)
    Hp = _round_up(H, 128)
    Op = _round_up(O, 128)
    Bp0 = _round_up(B, 8)
    n_btiles = 2 if Bp0 >= 16 else 1          # v7x megacore batch sharding
    Bt = _round_up(-(-Bp0 // n_btiles), 8)
    Bp = Bt * n_btiles

    # ---- VMEM budget (conservative: v7x floor of 64 MiB unless queryable).
    try:
        vmem_cap = int(pltpu.get_tpu_info().vmem_capacity_bytes)
    except Exception:
        vmem_cap = 64 * 1024 * 1024
    budget = int(vmem_cap * 0.70)
    wbuf = 1 if single_buffer_weights else 2
    fixed = (wbuf * ((Ip * Hp + Hp * Hp + Hp * Op) * itm + (Hp + Op) * 4)
             + 2 * Bt * Hp * 4        # h0 block (double buffered)
             + Bt * Hp * 4            # carried-h scratch
             + 2 * Bt * Op * 4)       # logits block
    per_t = Bt * (2 * Ip * itm + 2 * Hp * 4 + Hp * 4)   # x blk x2, hs blk x2, pre scratch
    max_T = max(1, (budget - fixed) // max(1, per_t))
    T = int(min(S, max_T)) if chunk is None else int(max(1, min(chunk, S, max_T)))

    Sp = _round_up(S, T)
    n_chunks = Sp // T
    rem = S - (n_chunks - 1) * T
    vmem_limit = int(min(vmem_cap, max(32 * 1024 * 1024, 2 * (fixed + T * per_t))))

    # ---- Zero-padded operands (weights in matmul dtype, biases / h0 in f32).
    xp = jnp.zeros((Sp, Bp, Ip), cd).at[:S, :B, :I].set(x.astype(cd))
    h0p = jnp.zeros((Bp, Hp), f32).at[:B, :H].set(h0.astype(f32))
    wxp = jnp.zeros((Ip, Hp), cd).at[:I, :H].set(w_x.astype(cd))
    whp = jnp.zeros((Hp, Hp), cd).at[:H, :H].set(w_h.astype(cd))
    bp = jnp.zeros((1, Hp), f32).at[0, :H].set(b.astype(f32))
    wdp = jnp.zeros((Hp, Op), cd).at[:H, :O].set(w_d.astype(cd))
    bdp = jnp.zeros((1, Op), f32).at[0, :O].set(b_d.astype(f32))

    kernel = _make_fused_rnn_kernel(T, rem, n_chunks, unroll, cd)

    def _build_and_call(use_single_buffer):
        def resident(shape):
            zeros = (0,) * len(shape)
            if use_single_buffer:
                return pl.BlockSpec(shape, lambda bi, ci: zeros,
                                    pipeline_mode=pl.Buffered(buffer_count=1))
            return pl.BlockSpec(shape, lambda bi, ci: zeros)

        in_specs = [
            pl.BlockSpec((T, Bt, Ip), lambda bi, ci: (ci, bi, 0)),   # x chunk
            resident((Ip, Hp)),                                      # W_x (resident)
            resident((1, Hp)),                                       # bias
            resident((Hp, Hp)),                                      # W_h (resident)
            pl.BlockSpec((Bt, Hp), lambda bi, ci: (bi, 0)),          # h0 (per batch tile)
            resident((Hp, Op)),                                      # W_d
            resident((1, Op)),                                       # b_d
        ]
        out_specs = [
            pl.BlockSpec((T, Bt, Hp), lambda bi, ci: (ci, bi, 0)),   # hidden states
            pl.BlockSpec((Bt, Op), lambda bi, ci: (bi, 0)),          # decoded logits
        ]
        return pl.pallas_call(
            kernel,
            out_shape=(
                jax.ShapeDtypeStruct((Sp, Bp, Hp), f32),
                jax.ShapeDtypeStruct((Bp, Op), f32),
            ),
            grid_spec=pltpu.PrefetchScalarGridSpec(
                num_scalar_prefetch=0,
                grid=(n_btiles, n_chunks),
                in_specs=in_specs,
                out_specs=out_specs,
                scratch_shapes=[
                    pltpu.VMEM((T, Bt, Hp), f32),   # per-chunk pre-activations
                    pltpu.VMEM((Bt, Hp), f32),      # carried hidden state
                ],
            ),
            compiler_params=pltpu.CompilerParams(
                # Batch tiles are independent (megacore-shardable on v7x);
                # the time-chunk axis carries h in scratch -> must stay sequential.
                dimension_semantics=("parallel", "arbitrary"),
                vmem_limit_bytes=vmem_limit,
            ),
        )(xp, wxp, bp, whp, h0p, wdp, bdp)

    if single_buffer_weights:
        try:
            hs_p, y_p = _build_and_call(True)
        except Exception:
            # Older JAX without BlockSpec pipeline_mode support.
            hs_p, y_p = _build_and_call(False)
    else:
        hs_p, y_p = _build_and_call(False)

    hs = hs_p[:S, :B, :H]
    y = y_p[:B, :O]
    return hs, y


def rnn_forward_ref(x, h0, w_x, w_h, b):
    """Plain-JAX reference matching the PyTorch loop."""
    def step(h, x_t):
        h_new = jnp.tanh(x_t @ w_x + h @ w_h + b)
        return h_new, h_new
    _, hs = jax.lax.scan(step, h0, x)
    return hs


if __name__ == "__main__":
    # Small, deterministic setup (matches the module: seq, batch, in, hidden, out).
    seq, batch, input_size, hidden_size, output_size = 8, 2, 4, 32, 10

    key = jax.random.PRNGKey(0)
    kx, kh0, kw, kb, kwd, kbd = jax.random.split(key, 6)

    x = jax.random.normal(kx, (seq, batch, input_size), dtype=jnp.float32)
    h0 = jax.random.normal(kh0, (batch, hidden_size), dtype=jnp.float32)

    # Parameters (PyTorch Linear layout (out, in) over cat([x, h]); split + transpose).
    fan_in = input_size + hidden_size
    lim = 1.0 / jnp.sqrt(fan_in)
    w_full = jax.random.uniform(
        kw, (hidden_size, fan_in), minval=-lim, maxval=lim, dtype=jnp.float32)
    b = jax.random.uniform(
        kb, (hidden_size,), minval=-lim, maxval=lim, dtype=jnp.float32)
    w_x = w_full[:, :input_size].T   # (input, hidden)
    w_h = w_full[:, input_size:].T   # (hidden, hidden)

    lim_d = 1.0 / jnp.sqrt(hidden_size)
    w_d = jax.random.uniform(
        kwd, (output_size, hidden_size), minval=-lim_d, maxval=lim_d,
        dtype=jnp.float32).T          # (hidden, output)
    b_d = jax.random.uniform(
        kbd, (output_size,), minval=-lim_d, maxval=lim_d, dtype=jnp.float32)

    # Plain-JAX reference.
    hs_ref = rnn_forward_ref(x, h0, w_x, w_h, b)
    logits_ref = hs_ref[-1] @ w_d + b_d

    # ---- f32 run (strict correctness check).
    hs, logits = rnn_forward(x, h0, w_x, w_h, b, w_d, b_d)
    hs = jax.block_until_ready(hs)
    logits = jax.block_until_ready(logits)

    assert hs.shape == (seq, batch, hidden_size)
    assert logits.shape == (batch, output_size)
    assert jnp.allclose(hs, hs_ref, atol=1e-5, rtol=1e-5)
    assert jnp.allclose(logits, logits_ref, atol=1e-5, rtol=1e-5)

    # ---- bf16-matmul run (~2x MXU throughput on v6e/v7x); loose tolerance.
    hs_bf, logits_bf = rnn_forward(x, h0, w_x, w_h, b, w_d, b_d,
                                   matmul_dtype=jnp.bfloat16)
    hs_bf = jax.block_until_ready(hs_bf)
    logits_bf = jax.block_until_ready(logits_bf)
    assert jnp.allclose(hs_bf, hs_ref, atol=5e-2, rtol=5e-2)
    assert jnp.allclose(logits_bf, logits_ref, atol=5e-2, rtol=5e-2)

    print("KERNEL_OK")
</pallas_src>

<mosaic_0001>
module attributes {stable_mosaic.version = 11 : i64} {
  func.func @kernel(%arg0: i32, %arg1: i32, %arg2: memref<8x8x128xf32, #tpu.memory_space<vmem>>, %arg3: memref<128x128xf32, #tpu.memory_space<vmem>>, %arg4: memref<1x128xf32, #tpu.memory_space<vmem>>, %arg5: memref<128x128xf32, #tpu.memory_space<vmem>>, %arg6: memref<8x128xf32, #tpu.memory_space<vmem>>, %arg7: memref<128x128xf32, #tpu.memory_space<vmem>>, %arg8: memref<1x128xf32, #tpu.memory_space<vmem>>, %arg9: memref<8x8x128xf32, #tpu.memory_space<vmem>>, %arg10: memref<8x128xf32, #tpu.memory_space<vmem>>, %arg11: memref<8x8x128xf32, #tpu.memory_space<vmem>>, %arg12: memref<8x128xf32, #tpu.memory_space<vmem>>) attributes {dimension_semantics = [#tpu.dimension_semantics<parallel>, #tpu.dimension_semantics<arbitrary>], iteration_bounds = array<i64: 1, 1>, scalar_prefetch = 0 : i64, scratch_operands = 2 : i64, tpu.core_type = #tpu.core_type<tc>, window_params = [{transform_indices = @transform_0, window_bounds = array<i64: 8, 8, 128>}, {pipeline_mode = #tpu.pipeline_mode<synchronous>, transform_indices = @transform_1, window_bounds = array<i64: 128, 128>}, {pipeline_mode = #tpu.pipeline_mode<synchronous>, transform_indices = @transform_2, window_bounds = array<i64: 1, 128>}, {pipeline_mode = #tpu.pipeline_mode<synchronous>, transform_indices = @transform_3, window_bounds = array<i64: 128, 128>}, {transform_indices = @transform_4, window_bounds = array<i64: 8, 128>}, {pipeline_mode = #tpu.pipeline_mode<synchronous>, transform_indices = @transform_5, window_bounds = array<i64: 128, 128>}, {pipeline_mode = #tpu.pipeline_mode<synchronous>, transform_indices = @transform_6, window_bounds = array<i64: 1, 128>}, {transform_indices = @transform_7, window_bounds = array<i64: 8, 8, 128>}, {transform_indices = @transform_8, window_bounds = array<i64: 8, 128>}]} {
    %c0_i32 = arith.constant 0 : i32
    %0 = arith.cmpi eq, %arg1, %c0_i32 : i32
    %1 = arith.extui %0 : i1 to i32
    %c0_i32_0 = arith.constant 0 : i32
    %2 = arith.cmpi ne, %1, %c0_i32_0 : i32
    scf.if %2 {
      %c0_59 = arith.constant 0 : index
      %c0_60 = arith.constant 0 : index
      %98 = vector.load %arg6[%c0_59, %c0_60] : memref<8x128xf32, #tpu.memory_space<vmem>>, vector<8x128xf32>
      %c0_61 = arith.constant 0 : index
      %c0_62 = arith.constant 0 : index
      %99 = vector.load %arg12[%c0_61, %c0_62] : memref<8x128xf32, #tpu.memory_space<vmem>>, vector<8x128xf32>
      tpu.vector_store %arg12[%c0_61, %c0_62], %98 {strides = array<i32>} : memref<8x128xf32, #tpu.memory_space<vmem>>, vector<8x128xf32>,
    } else {
    }
    %c0 = arith.constant 0 : index
    %c0_1 = arith.constant 0 : index
    %c0_2 = arith.constant 0 : index
    %3 = vector.load %arg2[%c0, %c0_1, %c0_2] : memref<8x8x128xf32, #tpu.memory_space<vmem>>, vector<8x8x128xf32>
    %4 = vector.shape_cast %3 : vector<8x8x128xf32> to vector<64x128xf32>
    %c0_3 = arith.constant 0 : index
    %c0_4 = arith.constant 0 : index
    %5 = vector.load %arg3[%c0_3, %c0_4] : memref<128x128xf32, #tpu.memory_space<vmem>>, vector<128x128xf32>
    %cst = arith.constant dense<0.000000e+00> : vector<64x128xf32>
    %6 = tpu.matmul %4, %5, %cst {dimension_numbers = #tpu.dot_dimension_numbers<[1], [0], [0], [1], [0, 0, 1, 1], [], []>} : vector<64x128xf32>, vector<128x128xf32>, vector<64x128xf32> -> vector<64x128xf32>
    %c0_5 = arith.constant 0 : index
    %c0_6 = arith.constant 0 : index
    %7 = vector.load %arg4[%c0_5, %c0_6] : memref<1x128xf32, #tpu.memory_space<vmem>>, vector<1x128xf32>
    %8 = vector.broadcast %7 : vector<1x128xf32> to vector<64x128xf32>
    %9 = arith.addf %6, %8 : vector<64x128xf32>
    %10 = vector.shape_cast %9 : vector<64x128xf32> to vector<8x8x128xf32>
    %c0_7 = arith.constant 0 : index
    %c0_8 = arith.constant 0 : index
    %c0_9 = arith.constant 0 : index
    %11 = vector.load %arg11[%c0_7, %c0_8, %c0_9] : memref<8x8x128xf32, #tpu.memory_space<vmem>>, vector<8x8x128xf32>
    tpu.vector_store %arg11[%c0_7, %c0_8, %c0_9], %10 {strides = array<i32>} : memref<8x8x128xf32, #tpu.memory_space<vmem>>, vector<8x8x128xf32>,
    %c0_10 = arith.constant 0 : index
    %c0_11 = arith.constant 0 : index
    %12 = vector.load %arg5[%c0_10, %c0_11] : memref<128x128xf32, #tpu.memory_space<vmem>>, vector<128x128xf32>
    %c0_12 = arith.constant 0 : index
    %c0_13 = arith.constant 0 : index
    %13 = vector.load %arg12[%c0_12, %c0_13] : memref<8x128xf32, #tpu.memory_space<vmem>>, vector<8x128xf32>
    %c0_i32_14 = arith.constant 0 : i32
    %14 = arith.index_cast %c0_i32_14 : i32 to index
    %c0_15 = arith.constant 0 : index
    %c0_16 = arith.constant 0 : index
    %15 = vector.load %arg11[%14, %c0_15, %c0_16] : memref<8x8x128xf32, #tpu.memory_space<vmem>>, vector<1x8x128xf32>
    %16 = vector.shape_cast %15 : vector<1x8x128xf32> to vector<8x128xf32>
    %cst_17 = arith.constant dense<0.000000e+00> : vector<8x128xf32>
    %17 = tpu.matmul %13, %12, %cst_17 {dimension_numbers = #tpu.dot_dimension_numbers<[1], [0], [0], [1], [0, 0, 1, 1], [], []>} : vector<8x128xf32>, vector<128x128xf32>, vector<8x128xf32> -> vector<8x128xf32>
    %18 = arith.addf %16, %17 : vector<8x128xf32>
    %19 = math.tanh %18 : vector<8x128xf32>
    %20 = arith.index_cast %c0_i32_14 : i32 to index
    %c0_18 = arith.constant 0 : index
    %c0_19 = arith.constant 0 : index
    %21 = vector.load %arg9[%20, %c0_18, %c0_19] : memref<8x8x128xf32, #tpu.memory_space<vmem>>, vector<1x8x128xf32>
    %22 = vector.shape_cast %21 : vector<1x8x128xf32> to vector<8x128xf32>
    %23 = vector.shape_cast %19 : vector<8x128xf32> to vector<1x8x128xf32>
    tpu.vector_store %arg9[%20, %c0_18, %c0_19], %23 {strides = array<i32>} : memref<8x8x128xf32, #tpu.memory_space<vmem>>, vector<1x8x128xf32>,
    %c1_i32 = arith.constant 1 : i32
    %24 = arith.index_cast %c1_i32 : i32 to index
    %c0_20 = arith.constant 0 : index
    %c0_21 = arith.constant 0 : index
    %25 = vector.load %arg11[%24, %c0_20, %c0_21] : memref<8x8x128xf32, #tpu.memory_space<vmem>>, vector<1x8x128xf32>
    %26 = vector.shape_cast %25 : vector<1x8x128xf32> to vector<8x128xf32>
    %cst_22 = arith.constant dense<0.000000e+00> : vector<8x128xf32>
    %27 = tpu.matmul %19, %12, %cst_22 {dimension_numbers = #tpu.dot_dimension_numbers<[1], [0], [0], [1], [0, 0, 1, 1], [], []>} : vector<8x128xf32>, vector<128x128xf32>, vector<8x128xf32> -> vector<8x128xf32>
    %28 = arith.addf %26, %27 : vector<8x128xf32>
    %29 = math.tanh %28 : vector<8x128xf32>
    %30 = arith.index_cast %c1_i32 : i32 to index
    %c0_23 = arith.constant 0 : index
    %c0_24 = arith.constant 0 : index
    %31 = vector.load %arg9[%30, %c0_23, %c0_24] : memref<8x8x128xf32, #tpu.memory_space<vmem>>, vector<1x8x128xf32>
    %32 = vector.shape_cast %31 : vector<1x8x128xf32> to vector<8x128xf32>
    %33 = vector.shape_cast %29 : vector<8x128xf32> to vector<1x8x128xf32>
    tpu.vector_store %arg9[%30, %c0_23, %c0_24], %33 {strides = array<i32>} : memref<8x8x128xf32, #tpu.memory_space<vmem>>, vector<1x8x128xf32>,
    %c2_i32 = arith.constant 2 : i32
    %34 = arith.index_cast %c2_i32 : i32 to index
    %c0_25 = arith.constant 0 : index
    %c0_26 = arith.constant 0 : index
    %35 = vector.load %arg11[%34, %c0_25, %c0_26] : memref<8x8x128xf32, #tpu.memory_space<vmem>>, vector<1x8x128xf32>
    %36 = vector.shape_cast %35 : vector<1x8x128xf32> to vector<8x128xf32>
    %cst_27 = arith.constant dense<0.000000e+00> : vector<8x128xf32>
    %37 = tpu.matmul %29, %12, %cst_27 {dimension_numbers = #tpu.dot_dimension_numbers<[1], [0], [0], [1], [0, 0, 1, 1], [], []>} : vector<8x128xf32>, vector<128x128xf32>, vector<8x128xf32> -> vector<8x128xf32>
    %38 = arith.addf %36, %37 : vector<8x128xf32>
    %39 = math.tanh %38 : vector<8x128xf32>
    %40 = arith.index_cast %c2_i32 : i32 to index
    %c0_28 = arith.constant 0 : index
    %c0_29 = arith.constant 0 : index
    %41 = vector.load %arg9[%40, %c0_28, %c0_29] : memref<8x8x128xf32, #tpu.memory_space<vmem>>, vector<1x8x128xf32>
    %42 = vector.shape_cast %41 : vector<1x8x128xf32> to vector<8x128xf32>
    %43 = vector.shape_cast %39 : vector<8x128xf32> to vector<1x8x128xf32>
    tpu.vector_store %arg9[%40, %c0_28, %c0_29], %43 {strides = array<i32>} : memref<8x8x128xf32, #tpu.memory_space<vmem>>, vector<1x8x128xf32>,
    %c3_i32 = arith.constant 3 : i32
    %44 = arith.index_cast %c3_i32 : i32 to index
    %c0_30 = arith.constant 0 : index
    %c0_31 = arith.constant 0 : index
    %45 = vector.load %arg11[%44, %c0_30, %c0_31] : memref<8x8x128xf32, #tpu.memory_space<vmem>>, vector<1x8x128xf32>
    %46 = vector.shape_cast %45 : vector<1x8x128xf32> to vector<8x128xf32>
    %cst_32 = arith.constant dense<0.000000e+00> : vector<8x128xf32>
    %47 = tpu.matmul %39, %12, %cst_32 {dimension_numbers = #tpu.dot_dimension_numbers<[1], [0], [0], [1], [0, 0, 1, 1], [], []>} : vector<8x128xf32>, vector<128x128xf32>, vector<8x128xf32> -> vector<8x128xf32>
    %48 = arith.addf %46, %47 : vector<8x128xf32>
    %49 = math.tanh %48 : vector<8x128xf32>
    %50 = arith.index_cast %c3_i32 : i32 to index
    %c0_33 = arith.constant 0 : index
    %c0_34 = arith.constant 0 : index
    %51 = vector.load %arg9[%50, %c0_33, %c0_34] : memref<8x8x128xf32, #tpu.memory_space<vmem>>, vector<1x8x128xf32>
    %52 = vector.shape_cast %51 : vector<1x8x128xf32> to vector<8x128xf32>
    %53 = vector.shape_cast %49 : vector<8x128xf32> to vector<1x8x128xf32>
    tpu.vector_store %arg9[%50, %c0_33, %c0_34], %53 {strides = array<i32>} : memref<8x8x128xf32, #tpu.memory_space<vmem>>, vector<1x8x128xf32>,
    %c4_i32 = arith.constant 4 : i32
    %54 = arith.index_cast %c4_i32 : i32 to index
    %c0_35 = arith.constant 0 : index
    %c0_36 = arith.constant 0 : index
    %55 = vector.load %arg11[%54, %c0_35, %c0_36] : memref<8x8x128xf32, #tpu.memory_space<vmem>>, vector<1x8x128xf32>
    %56 = vector.shape_cast %55 : vector<1x8x128xf32> to vector<8x128xf32>
    %cst_37 = arith.constant dense<0.000000e+00> : vector<8x128xf32>
    %57 = tpu.matmul %49, %12, %cst_37 {dimension_numbers = #tpu.dot_dimension_numbers<[1], [0], [0], [1], [0, 0, 1, 1], [], []>} : vector<8x128xf32>, vector<128x128xf32>, vector<8x128xf32> -> vector<8x128xf32>
    %58 = arith.addf %56, %57 : vector<8x128xf32>
    %59 = math.tanh %58 : vector<8x128xf32>
    %60 = arith.index_cast %c4_i32 : i32 to index
    %c0_38 = arith.constant 0 : index
    %c0_39 = arith.constant 0 : index
    %61 = vector.load %arg9[%60, %c0_38, %c0_39] : memref<8x8x128xf32, #tpu.memory_space<vmem>>, vector<1x8x128xf32>
    %62 = vector.shape_cast %61 : vector<1x8x128xf32> to vector<8x128xf32>
    %63 = vector.shape_cast %59 : vector<8x128xf32> to vector<1x8x128xf32>
    tpu.vector_store %arg9[%60, %c0_38, %c0_39], %63 {strides = array<i32>} : memref<8x8x128xf32, #tpu.memory_space<vmem>>, vector<1x8x128xf32>,
    %c5_i32 = arith.constant 5 : i32
    %64 = arith.index_cast %c5_i32 : i32 to index
    %c0_40 = arith.constant 0 : index
    %c0_41 = arith.constant 0 : index
    %65 = vector.load %arg11[%64, %c0_40, %c0_41] : memref<8x8x128xf32, #tpu.memory_space<vmem>>, vector<1x8x128xf32>
    %66 = vector.shape_cast %65 : vector<1x8x128xf32> to vector<8x128xf32>
    %cst_42 = arith.constant dense<0.000000e+00> : vector<8x128xf32>
    %67 = tpu.matmul %59, %12, %cst_42 {dimension_numbers = #tpu.dot_dimension_numbers<[1], [0], [0], [1], [0, 0, 1, 1], [], []>} : vector<8x128xf32>, vector<128x128xf32>, vector<8x128xf32> -> vector<8x128xf32>
    %68 = arith.addf %66, %67 : vector<8x128xf32>
    %69 = math.tanh %68 : vector<8x128xf32>
    %70 = arith.index_cast %c5_i32 : i32 to index
    %c0_43 = arith.constant 0 : index
    %c0_44 = arith.constant 0 : index
    %71 = vector.load %arg9[%70, %c0_43, %c0_44] : memref<8x8x128xf32, #tpu.memory_space<vmem>>, vector<1x8x128xf32>
    %72 = vector.shape_cast %71 : vector<1x8x128xf32> to vector<8x128xf32>
    %73 = vector.shape_cast %69 : vector<8x128xf32> to vector<1x8x128xf32>
    tpu.vector_store %arg9[%70, %c0_43, %c0_44], %73 {strides = array<i32>} : memref<8x8x128xf32, #tpu.memory_space<vmem>>, vector<1x8x128xf32>,
    %c6_i32 = arith.constant 6 : i32
    %74 = arith.index_cast %c6_i32 : i32 to index
    %c0_45 = arith.constant 0 : index
    %c0_46 = arith.constant 0 : index
    %75 = vector.load %arg11[%74, %c0_45, %c0_46] : memref<8x8x128xf32, #tpu.memory_space<vmem>>, vector<1x8x128xf32>
    %76 = vector.shape_cast %75 : vector<1x8x128xf32> to vector<8x128xf32>
    %cst_47 = arith.constant dense<0.000000e+00> : vector<8x128xf32>
    %77 = tpu.matmul %69, %12, %cst_47 {dimension_numbers = #tpu.dot_dimension_numbers<[1], [0], [0], [1], [0, 0, 1, 1], [], []>} : vector<8x128xf32>, vector<128x128xf32>, vector<8x128xf32> -> vector<8x128xf32>
    %78 = arith.addf %76, %77 : vector<8x128xf32>
    %79 = math.tanh %78 : vector<8x128xf32>
    %80 = arith.index_cast %c6_i32 : i32 to index
    %c0_48 = arith.constant 0 : index
    %c0_49 = arith.constant 0 : index
    %81 = vector.load %arg9[%80, %c0_48, %c0_49] : memref<8x8x128xf32, #tpu.memory_space<vmem>>, vector<1x8x128xf32>
    %82 = vector.shape_cast %81 : vector<1x8x128xf32> to vector<8x128xf32>
    %83 = vector.shape_cast %79 : vector<8x128xf32> to vector<1x8x128xf32>
    tpu.vector_store %arg9[%80, %c0_48, %c0_49], %83 {strides = array<i32>} : memref<8x8x128xf32, #tpu.memory_space<vmem>>, vector<1x8x128xf32>,
    %c7_i32 = arith.constant 7 : i32
    %84 = arith.index_cast %c7_i32 : i32 to index
    %c0_50 = arith.constant 0 : index
    %c0_51 = arith.constant 0 : index
    %85 = vector.load %arg11[%84, %c0_50, %c0_51] : memref<8x8x128xf32, #tpu.memory_space<vmem>>, vector<1x8x128xf32>
    %86 = vector.shape_cast %85 : vector<1x8x128xf32> to vector<8x128xf32>
    %cst_52 = arith.constant dense<0.000000e+00> : vector<8x128xf32>
    %87 = tpu.matmul %79, %12, %cst_52 {dimension_numbers = #tpu.dot_dimension_numbers<[1], [0], [0], [1], [0, 0, 1, 1], [], []>} : vector<8x128xf32>, vector<128x128xf32>, vector<8x128xf32> -> vector<8x128xf32>
    %88 = arith.addf %86, %87 : vector<8x128xf32>
    %89 = math.tanh %88 : vector<8x128xf32>
    %90 = arith.index_cast %c7_i32 : i32 to index
    %c0_53 = arith.constant 0 : index
    %c0_54 = arith.constant 0 : index
    %91 = vector.load %arg9[%90, %c0_53, %c0_54] : memref<8x8x128xf32, #tpu.memory_space<vmem>>, vector<1x8x128xf32>
    %92 = vector.shape_cast %91 : vector<1x8x128xf32> to vector<8x128xf32>
    %93 = vector.shape_cast %89 : vector<8x128xf32> to vector<1x8x128xf32>
    tpu.vector_store %arg9[%90, %c0_53, %c0_54], %93 {strides = array<i32>} : memref<8x8x128xf32, #tpu.memory_space<vmem>>, vector<1x8x128xf32>,
    %c8_i32 = arith.constant 8 : i32
    %c0_55 = arith.constant 0 : index
    %c0_56 = arith.constant 0 : index
    %94 = vector.load %arg12[%c0_55, %c0_56] : memref<8x128xf32, #tpu.memory_space<vmem>>, vector<8x128xf32>
    tpu.vector_store %arg12[%c0_55, %c0_56], %89 {strides = array<i32>} : memref<8x128xf32, #tpu.memory_space<vmem>>, vector<8x128xf32>,
    %c0_i32_57 = arith.constant 0 : i32
    %95 = arith.cmpi eq, %arg1, %c0_i32_57 : i32
    %96 = arith.extui %95 : i1 to i32
    %c0_i32_58 = arith.constant 0 : i32
    %97 = arith.cmpi ne, %96, %c0_i32_58 : i32
    scf.if %97 {
      %c0_59 = arith.constant 0 : index
      %c0_60 = arith.constant 0 : index
      %98 = vector.load %arg12[%c0_59, %c0_60] : memref<8x128xf32, #tpu.memory_space<vmem>>, vector<8x128xf32>
      %c0_61 = arith.constant 0 : index
      %c0_62 = arith.constant 0 : index
      %99 = vector.load %arg7[%c0_61, %c0_62] : memref<128x128xf32, #tpu.memory_space<vmem>>, vector<128x128xf32>
      %cst_63 = arith.constant dense<0.000000e+00> : vector<8x128xf32>
      %100 = tpu.matmul %98, %99, %cst_63 {dimension_numbers = #tpu.dot_dimension_numbers<[1], [0], [0], [1], [0, 0, 1, 1], [], []>} : vector<8x128xf32>, vector<128x128xf32>, vector<8x128xf32> -> vector<8x128xf32>
      %c0_64 = arith.constant 0 : index
      %c0_65 = arith.constant 0 : index
      %101 = vector.load %arg8[%c0_64, %c0_65] : memref<1x128xf32, #tpu.memory_space<vmem>>, vector<1x128xf32>
      %102 = vector.broadcast %101 : vector<1x128xf32> to vector<8x128xf32>
      %103 = arith.addf %100, %102 : vector<8x128xf32>
      %c0_66 = arith.constant 0 : index
      %c0_67 = arith.constant 0 : index
      %104 = vector.load %arg10[%c0_66, %c0_67] : memref<8x128xf32, #tpu.memory_space<vmem>>, vector<8x128xf32>
      tpu.vector_store %arg10[%c0_66, %c0_67], %103 {strides = array<i32>} : memref<8x128xf32, #tpu.memory_space<vmem>>, vector<8x128xf32>,
    } else {
    }
    return
  }
  func.func @transform_0(%arg0: i32, %arg1: i32) -> (i32, i32, i32) {
    %c0_i32 = arith.constant 0 : i32
    %c0_i32_0 = arith.constant 0 : i32
    return %arg1, %arg0, %c0_i32 : i32, i32, i32
  }
  func.func @transform_1(%arg0: i32, %arg1: i32) -> (i32, i32) {
    %c0_i32 = arith.constant 0 : i32
    %c0_i32_0 = arith.constant 0 : i32
    %c0_i32_1 = arith.constant 0 : i32
    return %c0_i32, %c0_i32_0 : i32, i32
  }
  func.func @transform_2(%arg0: i32, %arg1: i32) -> (i32, i32) {
    %c0_i32 = arith.constant 0 : i32
    %c0_i32_0 = arith.constant 0 : i32
    %c0_i32_1 = arith.constant 0 : i32
    return %c0_i32, %c0_i32_0 : i32, i32
  }
  func.func @transform_3(%arg0: i32, %arg1: i32) -> (i32, i32) {
    %c0_i32 = arith.constant 0 : i32
    %c0_i32_0 = arith.constant 0 : i32
    %c0_i32_1 = arith.constant 0 : i32
    return %c0_i32, %c0_i32_0 : i32, i32
  }
  func.func @transform_4(%arg0: i32, %arg1: i32) -> (i32, i32) {
    %c0_i32 = arith.constant 0 : i32
    %c0_i32_0 = arith.constant 0 : i32
    return %arg0, %c0_i32 : i32, i32
  }
  func.func @transform_5(%arg0: i32, %arg1: i32) -> (i32, i32) {
    %c0_i32 = arith.constant 0 : i32
    %c0_i32_0 = arith.constant 0 : i32
    %c0_i32_1 = arith.constant 0 : i32
    return %c0_i32, %c0_i32_0 : i32, i32
  }
  func.func @transform_6(%arg0: i32, %arg1: i32) -> (i32, i32) {
    %c0_i32 = arith.constant 0 : i32
    %c0_i32_0 = arith.constant 0 : i32
    %c0_i32_1 = arith.constant 0 : i32
    return %c0_i32, %c0_i32_0 : i32, i32
  }
  func.func @transform_7(%arg0: i32, %arg1: i32) -> (i32, i32, i32) {
    %c0_i32 = arith.constant 0 : i32
    %c0_i32_0 = arith.constant 0 : i32
    return %arg1, %arg0, %c0_i32 : i32, i32, i32
  }
  func.func @transform_8(%arg0: i32, %arg1: i32) -> (i32, i32) {
    %c0_i32 = arith.constant 0 : i32
    %c0_i32_0 = arith.constant 0 : i32
    return %arg0, %c0_i32 : i32, i32
  }
}

module attributes {stable_mosaic.version = 11 : i64} {
  func.func @kernel(%arg0: i32, %arg1: i32, %arg2: memref<8x8x128xf32, #tpu.memory_space<vmem>>, %arg3: memref<128x128xf32, #tpu.memory_space<vmem>>, %arg4: memref<1x128xf32, #tpu.memory_space<vmem>>, %arg5: memref<128x128xf32, #tpu.memory_space<vmem>>, %arg6: memref<8x128xf32, #tpu.memory_space<vmem>>, %arg7: memref<128x128xf32, #tpu.memory_space<vmem>>, %arg8: memref<1x128xf32, #tpu.memory_space<vmem>>, %arg9: memref<8x8x128xf32, #tpu.memory_space<vmem>>, %arg10: memref<8x128xf32, #tpu.memory_space<vmem>>, %arg11: memref<8x8x128xf32, #tpu.memory_space<vmem>>, %arg12: memref<8x128xf32, #tpu.memory_space<vmem>>) attributes {dimension_semantics = [#tpu.dimension_semantics<parallel>, #tpu.dimension_semantics<arbitrary>], iteration_bounds = array<i64: 1, 1>, scalar_prefetch = 0 : i64, scratch_operands = 2 : i64, tpu.core_type = #tpu.core_type<tc>, window_params = [{transform_indices = @transform_0, window_bounds = array<i64: 8, 8, 128>}, {pipeline_mode = #tpu.pipeline_mode<synchronous>, transform_indices = @transform_1, window_bounds = array<i64: 128, 128>}, {pipeline_mode = #tpu.pipeline_mode<synchronous>, transform_indices = @transform_2, window_bounds = array<i64: 1, 128>}, {pipeline_mode = #tpu.pipeline_mode<synchronous>, transform_indices = @transform_3, window_bounds = array<i64: 128, 128>}, {transform_indices = @transform_4, window_bounds = array<i64: 8, 128>}, {pipeline_mode = #tpu.pipeline_mode<synchronous>, transform_indices = @transform_5, window_bounds = array<i64: 128, 128>}, {pipeline_mode = #tpu.pipeline_mode<synchronous>, transform_indices = @transform_6, window_bounds = array<i64: 1, 128>}, {transform_indices = @transform_7, window_bounds = array<i64: 8, 8, 128>}, {transform_indices = @transform_8, window_bounds = array<i64: 8, 128>}]} {
    %c0_i32 = arith.constant 0 : i32
    %0 = arith.cmpi eq, %arg1, %c0_i32 : i32
    %1 = arith.extui %0 : i1 to i32
    %c0_i32_0 = arith.constant 0 : i32
    %2 = arith.cmpi ne, %1, %c0_i32_0 : i32
    scf.if %2 {
      %c0_59 = arith.constant 0 : index
      %c0_60 = arith.constant 0 : index
      %98 = vector.load %arg6[%c0_59, %c0_60] : memref<8x128xf32, #tpu.memory_space<vmem>>, vector<8x128xf32>
      %c0_61 = arith.constant 0 : index
      %c0_62 = arith.constant 0 : index
      %99 = vector.load %arg12[%c0_61, %c0_62] : memref<8x128xf32, #tpu.memory_space<vmem>>, vector<8x128xf32>
      tpu.vector_store %arg12[%c0_61, %c0_62], %98 {strides = array<i32>} : memref<8x128xf32, #tpu.memory_space<vmem>>, vector<8x128xf32>,
    } else {
    }
    %c0 = arith.constant 0 : index
    %c0_1 = arith.constant 0 : index
    %c0_2 = arith.constant 0 : index
    %3 = vector.load %arg2[%c0, %c0_1, %c0_2] : memref<8x8x128xf32, #tpu.memory_space<vmem>>, vector<8x8x128xf32>
    %4 = vector.shape_cast %3 : vector<8x8x128xf32> to vector<64x128xf32>
    %c0_3 = arith.constant 0 : index
    %c0_4 = arith.constant 0 : index
    %5 = vector.load %arg3[%c0_3, %c0_4] : memref<128x128xf32, #tpu.memory_space<vmem>>, vector<128x128xf32>
    %cst = arith.constant dense<0.000000e+00> : vector<64x128xf32>
    %6 = tpu.matmul %4, %5, %cst {dimension_numbers = #tpu.dot_dimension_numbers<[1], [0], [0], [1], [0, 0, 1, 1], [], []>} : vector<64x128xf32>, vector<128x128xf32>, vector<64x128xf32> -> vector<64x128xf32>
    %c0_5 = arith.constant 0 : index
    %c0_6 = arith.constant 0 : index
    %7 = vector.load %arg4[%c0_5, %c0_6] : memref<1x128xf32, #tpu.memory_space<vmem>>, vector<1x128xf32>
    %8 = vector.broadcast %7 : vector<1x128xf32> to vector<64x128xf32>
    %9 = arith.addf %6, %8 : vector<64x128xf32>
    %10 = vector.shape_cast %9 : vector<64x128xf32> to vector<8x8x128xf32>
    %c0_7 = arith.constant 0 : index
    %c0_8 = arith.constant 0 : index
    %c0_9 = arith.constant 0 : index
    %11 = vector.load %arg11[%c0_7, %c0_8, %c0_9] : memref<8x8x128xf32, #tpu.memory_space<vmem>>, vector<8x8x128xf32>
    tpu.vector_store %arg11[%c0_7, %c0_8, %c0_9], %10 {strides = array<i32>} : memref<8x8x128xf32, #tpu.memory_space<vmem>>, vector<8x8x128xf32>,
    %c0_10 = arith.constant 0 : index
    %c0_11 = arith.constant 0 : index
    %12 = vector.load %arg5[%c0_10, %c0_11] : memref<128x128xf32, #tpu.memory_space<vmem>>, vector<128x128xf32>
    %c0_12 = arith.constant 0 : index
    %c0_13 = arith.constant 0 : index
    %13 = vector.load %arg12[%c0_12, %c0_13] : memref<8x128xf32, #tpu.memory_space<vmem>>, vector<8x128xf32>
    %c0_i32_14 = arith.constant 0 : i32
    %14 = arith.index_cast %c0_i32_14 : i32 to index
    %c0_15 = arith.constant 0 : index
    %c0_16 = arith.constant 0 : index
    %15 = vector.load %arg11[%14, %c0_15, %c0_16] : memref<8x8x128xf32, #tpu.memory_space<vmem>>, vector<1x8x128xf32>
    %16 = vector.shape_cast %15 : vector<1x8x128xf32> to vector<8x128xf32>
    %cst_17 = arith.constant dense<0.000000e+00> : vector<8x128xf32>
    %17 = tpu.matmul %13, %12, %cst_17 {dimension_numbers = #tpu.dot_dimension_numbers<[1], [0], [0], [1], [0, 0, 1, 1], [], []>} : vector<8x128xf32>, vector<128x128xf32>, vector<8x128xf32> -> vector<8x128xf32>
    %18 = arith.addf %16, %17 : vector<8x128xf32>
    %19 = math.tanh %18 : vector<8x128xf32>
    %20 = arith.index_cast %c0_i32_14 : i32 to index
    %c0_18 = arith.constant 0 : index
    %c0_19 = arith.constant 0 : index
    %21 = vector.load %arg9[%20, %c0_18, %c0_19] : memref<8x8x128xf32, #tpu.memory_space<vmem>>, vector<1x8x128xf32>
    %22 = vector.shape_cast %21 : vector<1x8x128xf32> to vector<8x128xf32>
    %23 = vector.shape_cast %19 : vector<8x128xf32> to vector<1x8x128xf32>
    tpu.vector_store %arg9[%20, %c0_18, %c0_19], %23 {strides = array<i32>} : memref<8x8x128xf32, #tpu.memory_space<vmem>>, vector<1x8x128xf32>,
    %c1_i32 = arith.constant 1 : i32
    %24 = arith.index_cast %c1_i32 : i32 to index
    %c0_20 = arith.constant 0 : index
    %c0_21 = arith.constant 0 : index
    %25 = vector.load %arg11[%24, %c0_20, %c0_21] : memref<8x8x128xf32, #tpu.memory_space<vmem>>, vector<1x8x128xf32>
    %26 = vector.shape_cast %25 : vector<1x8x128xf32> to vector<8x128xf32>
    %cst_22 = arith.constant dense<0.000000e+00> : vector<8x128xf32>
    %27 = tpu.matmul %19, %12, %cst_22 {dimension_numbers = #tpu.dot_dimension_numbers<[1], [0], [0], [1], [0, 0, 1, 1], [], []>} : vector<8x128xf32>, vector<128x128xf32>, vector<8x128xf32> -> vector<8x128xf32>
    %28 = arith.addf %26, %27 : vector<8x128xf32>
    %29 = math.tanh %28 : vector<8x128xf32>
    %30 = arith.index_cast %c1_i32 : i32 to index
    %c0_23 = arith.constant 0 : index
    %c0_24 = arith.constant 0 : index
    %31 = vector.load %arg9[%30, %c0_23, %c0_24] : memref<8x8x128xf32, #tpu.memory_space<vmem>>, vector<1x8x128xf32>
    %32 = vector.shape_cast %31 : vector<1x8x128xf32> to vector<8x128xf32>
    %33 = vector.shape_cast %29 : vector<8x128xf32> to vector<1x8x128xf32>
    tpu.vector_store %arg9[%30, %c0_23, %c0_24], %33 {strides = array<i32>} : memref<8x8x128xf32, #tpu.memory_space<vmem>>, vector<1x8x128xf32>,
    %c2_i32 = arith.constant 2 : i32
    %34 = arith.index_cast %c2_i32 : i32 to index
    %c0_25 = arith.constant 0 : index
    %c0_26 = arith.constant 0 : index
    %35 = vector.load %arg11[%34, %c0_25, %c0_26] : memref<8x8x128xf32, #tpu.memory_space<vmem>>, vector<1x8x128xf32>
    %36 = vector.shape_cast %35 : vector<1x8x128xf32> to vector<8x128xf32>
    %cst_27 = arith.constant dense<0.000000e+00> : vector<8x128xf32>
    %37 = tpu.matmul %29, %12, %cst_27 {dimension_numbers = #tpu.dot_dimension_numbers<[1], [0], [0], [1], [0, 0, 1, 1], [], []>} : vector<8x128xf32>, vector<128x128xf32>, vector<8x128xf32> -> vector<8x128xf32>
    %38 = arith.addf %36, %37 : vector<8x128xf32>
    %39 = math.tanh %38 : vector<8x128xf32>
    %40 = arith.index_cast %c2_i32 : i32 to index
    %c0_28 = arith.constant 0 : index
    %c0_29 = arith.constant 0 : index
    %41 = vector.load %arg9[%40, %c0_28, %c0_29] : memref<8x8x128xf32, #tpu.memory_space<vmem>>, vector<1x8x128xf32>
    %42 = vector.shape_cast %41 : vector<1x8x128xf32> to vector<8x128xf32>
    %43 = vector.shape_cast %39 : vector<8x128xf32> to vector<1x8x128xf32>
    tpu.vector_store %arg9[%40, %c0_28, %c0_29], %43 {strides = array<i32>} : memref<8x8x128xf32, #tpu.memory_space<vmem>>, vector<1x8x128xf32>,
    %c3_i32 = arith.constant 3 : i32
    %44 = arith.index_cast %c3_i32 : i32 to index
    %c0_30 = arith.constant 0 : index
    %c0_31 = arith.constant 0 : index
    %45 = vector.load %arg11[%44, %c0_30, %c0_31] : memref<8x8x128xf32, #tpu.memory_space<vmem>>, vector<1x8x128xf32>
    %46 = vector.shape_cast %45 : vector<1x8x128xf32> to vector<8x128xf32>
    %cst_32 = arith.constant dense<0.000000e+00> : vector<8x128xf32>
    %47 = tpu.matmul %39, %12, %cst_32 {dimension_numbers = #tpu.dot_dimension_numbers<[1], [0], [0], [1], [0, 0, 1, 1], [], []>} : vector<8x128xf32>, vector<128x128xf32>, vector<8x128xf32> -> vector<8x128xf32>
    %48 = arith.addf %46, %47 : vector<8x128xf32>
    %49 = math.tanh %48 : vector<8x128xf32>
    %50 = arith.index_cast %c3_i32 : i32 to index
    %c0_33 = arith.constant 0 : index
    %c0_34 = arith.constant 0 : index
    %51 = vector.load %arg9[%50, %c0_33, %c0_34] : memref<8x8x128xf32, #tpu.memory_space<vmem>>, vector<1x8x128xf32>
    %52 = vector.shape_cast %51 : vector<1x8x128xf32> to vector<8x128xf32>
    %53 = vector.shape_cast %49 : vector<8x128xf32> to vector<1x8x128xf32>
    tpu.vector_store %arg9[%50, %c0_33, %c0_34], %53 {strides = array<i32>} : memref<8x8x128xf32, #tpu.memory_space<vmem>>, vector<1x8x128xf32>,
    %c4_i32 = arith.constant 4 : i32
    %54 = arith.index_cast %c4_i32 : i32 to index
    %c0_35 = arith.constant 0 : index
    %c0_36 = arith.constant 0 : index
    %55 = vector.load %arg11[%54, %c0_35, %c0_36] : memref<8x8x128xf32, #tpu.memory_space<vmem>>, vector<1x8x128xf32>
    %56 = vector.shape_cast %55 : vector<1x8x128xf32> to vector<8x128xf32>
    %cst_37 = arith.constant dense<0.000000e+00> : vector<8x128xf32>
    %57 = tpu.matmul %49, %12, %cst_37 {dimension_numbers = #tpu.dot_dimension_numbers<[1], [0], [0], [1], [0, 0, 1, 1], [], []>} : vector<8x128xf32>, vector<128x128xf32>, vector<8x128xf32> -> vector<8x128xf32>
    %58 = arith.addf %56, %57 : vector<8x128xf32>
    %59 = math.tanh %58 : vector<8x128xf32>
    %60 = arith.index_cast %c4_i32 : i32 to index
    %c0_38 = arith.constant 0 : index
    %c0_39 = arith.constant 0 : index
    %61 = vector.load %arg9[%60, %c0_38, %c0_39] : memref<8x8x128xf32, #tpu.memory_space<vmem>>, vector<1x8x128xf32>
    %62 = vector.shape_cast %61 : vector<1x8x128xf32> to vector<8x128xf32>
    %63 = vector.shape_cast %59 : vector<8x128xf32> to vector<1x8x128xf32>
    tpu.vector_store %arg9[%60, %c0_38, %c0_39], %63 {strides = array<i32>} : memref<8x8x128xf32, #tpu.memory_space<vmem>>, vector<1x8x128xf32>,
    %c5_i32 = arith.constant 5 : i32
    %64 = arith.index_cast %c5_i32 : i32 to index
    %c0_40 = arith.constant 0 : index
    %c0_41 = arith.constant 0 : index
    %65 = vector.load %arg11[%64, %c0_40, %c0_41] : memref<8x8x128xf32, #tpu.memory_space<vmem>>, vector<1x8x128xf32>
    %66 = vector.shape_cast %65 : vector<1x8x128xf32> to vector<8x128xf32>
    %cst_42 = arith.constant dense<0.000000e+00> : vector<8x128xf32>
    %67 = tpu.matmul %59, %12, %cst_42 {dimension_numbers = #tpu.dot_dimension_numbers<[1], [0], [0], [1], [0, 0, 1, 1], [], []>} : vector<8x128xf32>, vector<128x128xf32>, vector<8x128xf32> -> vector<8x128xf32>
    %68 = arith.addf %66, %67 : vector<8x128xf32>
    %69 = math.tanh %68 : vector<8x128xf32>
    %70 = arith.index_cast %c5_i32 : i32 to index
    %c0_43 = arith.constant 0 : index
    %c0_44 = arith.constant 0 : index
    %71 = vector.load %arg9[%70, %c0_43, %c0_44] : memref<8x8x128xf32, #tpu.memory_space<vmem>>, vector<1x8x128xf32>
    %72 = vector.shape_cast %71 : vector<1x8x128xf32> to vector<8x128xf32>
    %73 = vector.shape_cast %69 : vector<8x128xf32> to vector<1x8x128xf32>
    tpu.vector_store %arg9[%70, %c0_43, %c0_44], %73 {strides = array<i32>} : memref<8x8x128xf32, #tpu.memory_space<vmem>>, vector<1x8x128xf32>,
    %c6_i32 = arith.constant 6 : i32
    %74 = arith.index_cast %c6_i32 : i32 to index
    %c0_45 = arith.constant 0 : index
    %c0_46 = arith.constant 0 : index
    %75 = vector.load %arg11[%74, %c0_45, %c0_46] : memref<8x8x128xf32, #tpu.memory_space<vmem>>, vector<1x8x128xf32>
    %76 = vector.shape_cast %75 : vector<1x8x128xf32> to vector<8x128xf32>
    %cst_47 = arith.constant dense<0.000000e+00> : vector<8x128xf32>
    %77 = tpu.matmul %69, %12, %cst_47 {dimension_numbers = #tpu.dot_dimension_numbers<[1], [0], [0], [1], [0, 0, 1, 1], [], []>} : vector<8x128xf32>, vector<128x128xf32>, vector<8x128xf32> -> vector<8x128xf32>
    %78 = arith.addf %76, %77 : vector<8x128xf32>
    %79 = math.tanh %78 : vector<8x128xf32>
    %80 = arith.index_cast %c6_i32 : i32 to index
    %c0_48 = arith.constant 0 : index
    %c0_49 = arith.constant 0 : index
    %81 = vector.load %arg9[%80, %c0_48, %c0_49] : memref<8x8x128xf32, #tpu.memory_space<vmem>>, vector<1x8x128xf32>
    %82 = vector.shape_cast %81 : vector<1x8x128xf32> to vector<8x128xf32>
    %83 = vector.shape_cast %79 : vector<8x128xf32> to vector<1x8x128xf32>
    tpu.vector_store %arg9[%80, %c0_48, %c0_49], %83 {strides = array<i32>} : memref<8x8x128xf32, #tpu.memory_space<vmem>>, vector<1x8x128xf32>,
    %c7_i32 = arith.constant 7 : i32
    %84 = arith.index_cast %c7_i32 : i32 to index
    %c0_50 = arith.constant 0 : index
    %c0_51 = arith.constant 0 : index
    %85 = vector.load %arg11[%84, %c0_50, %c0_51] : memref<8x8x128xf32, #tpu.memory_space<vmem>>, vector<1x8x128xf32>
    %86 = vector.shape_cast %85 : vector<1x8x128xf32> to vector<8x128xf32>
    %cst_52 = arith.constant dense<0.000000e+00> : vector<8x128xf32>
    %87 = tpu.matmul %79, %12, %cst_52 {dimension_numbers = #tpu.dot_dimension_numbers<[1], [0], [0], [1], [0, 0, 1, 1], [], []>} : vector<8x128xf32>, vector<128x128xf32>, vector<8x128xf32> -> vector<8x128xf32>
    %88 = arith.addf %86, %87 : vector<8x128xf32>
    %89 = math.tanh %88 : vector<8x128xf32>
    %90 = arith.index_cast %c7_i32 : i32 to index
    %c0_53 = arith.constant 0 : index
    %c0_54 = arith.constant 0 : index
    %91 = vector.load %arg9[%90, %c0_53, %c0_54] : memref<8x8x128xf32, #tpu.memory_space<vmem>>, vector<1x8x128xf32>
    %92 = vector.shape_cast %91 : vector<1x8x128xf32> to vector<8x128xf32>
    %93 = vector.shape_cast %89 : vector<8x128xf32> to vector<1x8x128xf32>
    tpu.vector_store %arg9[%90, %c0_53, %c0_54], %93 {strides = array<i32>} : memref<8x8x128xf32, #tpu.memory_space<vmem>>, vector<1x8x128xf32>,
    %c8_i32 = arith.constant 8 : i32
    %c0_55 = arith.constant 0 : index
    %c0_56 = arith.constant 0 : index
    %94 = vector.load %arg12[%c0_55, %c0_56] : memref<8x128xf32, #tpu.memory_space<vmem>>, vector<8x128xf32>
    tpu.vector_store %arg12[%c0_55, %c0_56], %89 {strides = array<i32>} : memref<8x128xf32, #tpu.memory_space<vmem>>, vector<8x128xf32>,
    %c0_i32_57 = arith.constant 0 : i32
    %95 = arith.cmpi eq, %arg1, %c0_i32_57 : i32
    %96 = arith.extui %95 : i1 to i32
    %c0_i32_58 = arith.constant 0 : i32
    %97 = arith.cmpi ne, %96, %c0_i32_58 : i32
    scf.if %97 {
      %c0_59 = arith.constant 0 : index
      %c0_60 = arith.constant 0 : index
      %98 = vector.load %arg12[%c0_59, %c0_60] : memref<8x128xf32, #tpu.memory_space<vmem>>, vector<8x128xf32>
      %c0_61 = arith.constant 0 : index
      %c0_62 = arith.constant 0 : index
      %99 = vector.load %arg7[%c0_61, %c0_62] : memref<128x128xf32, #tpu.memory_space<vmem>>, vector<128x128xf32>
      %cst_63 = arith.constant dense<0.000000e+00> : vector<8x128xf32>
      %100 = tpu.matmul %98, %99, %cst_63 {dimension_numbers = #tpu.dot_dimension_numbers<[1], [0], [0], [1], [0, 0, 1, 1], [], []>} : vector<8x128xf32>, vector<128x128xf32>, vector<8x128xf32> -> vector<8x128xf32>
      %c0_64 = arith.constant 0 : index
      %c0_65 = arith.constant 0 : index
      %101 = vector.load %arg8[%c0_64, %c0_65] : memref<1x128xf32, #tpu.memory_space<vmem>>, vector<1x128xf32>
      %102 = vector.broadcast %101 : vector<1x128xf32> to vector<8x128xf32>
      %103 = arith.addf %100, %102 : vector<8x128xf32>
      %c0_66 = arith.constant 0 : index
      %c0_67 = arith.constant 0 : index
      %104 = vector.load %arg10[%c0_66, %c0_67] : memref<8x128xf32, #tpu.memory_space<vmem>>, vector<8x128xf32>
      tpu.vector_store %arg10[%c0_66, %c0_67], %103 {strides = array<i32>} : memref<8x128xf32, #tpu.memory_space<vmem>>, vector<8x128xf32>,
    } else {
    }
    return
  }
  func.func @transform_0(%arg0: i32, %arg1: i32) -> (i32, i32, i32) {
    %c0_i32 = arith.constant 0 : i32
    %c0_i32_0 = arith.constant 0 : i32
    return %arg1, %arg0, %c0_i32 : i32, i32, i32
  }
  func.func @transform_1(%arg0: i32, %arg1: i32) -> (i32, i32) {
    %c0_i32 = arith.constant 0 : i32
    %c0_i32_0 = arith.constant 0 : i32
    %c0_i32_1 = arith.constant 0 : i32
    return %c0_i32, %c0_i32_0 : i32, i32
  }
  func.func @transform_2(%arg0: i32, %arg1: i32) -> (i32, i32) {
    %c0_i32 = arith.constant 0 : i32
    %c0_i32_0 = arith.constant 0 : i32
    %c0_i32_1 = arith.constant 0 : i32
    return %c0_i32, %c0_i32_0 : i32, i32
  }
  func.func @transform_3(%arg0: i32, %arg1: i32) -> (i32, i32) {
    %c0_i32 = arith.constant 0 : i32
    %c0_i32_0 = arith.constant 0 : i32
    %c0_i32_1 = arith.constant 0 : i32
    return %c0_i32, %c0_i32_0 : i32, i32
  }
  func.func @transform_4(%arg0: i32, %arg1: i32) -> (i32, i32) {
    %c0_i32 = arith.constant 0 : i32
    %c0_i32_0 = arith.constant 0 : i32
    return %arg0, %c0_i32 : i32, i32
  }
  func.func @transform_5(%arg0: i32, %arg1: i32) -> (i32, i32) {
    %c0_i32 = arith.constant 0 : i32
    %c0_i32_0 = arith.constant 0 : i32
    %c0_i32_1 = arith.constant 0 : i32
    return %c0_i32, %c0_i32_0 : i32, i32
  }
  func.func @transform_6(%arg0: i32, %arg1: i32) -> (i32, i32) {
    %c0_i32 = arith.constant 0 : i32
    %c0_i32_0 = arith.constant 0 : i32
    %c0_i32_1 = arith.constant 0 : i32
    return %c0_i32, %c0_i32_0 : i32, i32
  }
  func.func @transform_7(%arg0: i32, %arg1: i32) -> (i32, i32, i32) {
    %c0_i32 = arith.constant 0 : i32
    %c0_i32_0 = arith.constant 0 : i32
    return %arg1, %arg0, %c0_i32 : i32, i32, i32
  }
  func.func @transform_8(%arg0: i32, %arg1: i32) -> (i32, i32) {
    %c0_i32 = arith.constant 0 : i32
    %c0_i32_0 = arith.constant 0 : i32
    return %arg0, %c0_i32 : i32, i32
  }
}

</mosaic_0001>

<bundles_post_ra>
// kernel: tpu_custom_call.1
= control target key start
LH: loop header
LB: loop body
LE: loop exit
PB: predicated region body
PF: predicated region fallthrough
CT: control target
= control target key end

     0   :  { %14 = vsyncpa [#allocation5], 0  ;;  %s2303_s0 = inlined_call_operand.hbm [shape: f32[8,8,128], index: 0, kind: input, shape index: {}]   ;;  %s2304_s1 = inlined_call_operand.hbm [shape: f32[128,128], index: 1, kind: input, shape index: {}]   ;;  %s2305_s2 = inlined_call_operand.vmem [shape: f32[1,128], index: 2, kind: input, shape index: {}]   ;;  %s2306_s3 = inlined_call_operand.hbm [shape: f32[128,128], index: 3, kind: input, shape index: {}]   ;;  %s2307_s4 = inlined_call_operand.vmem [shape: f32[8,128], index: 4, kind: input, shape index: {}]   ;;  %s2308_s5 = inlined_call_operand.hbm [shape: f32[128,128], index: 5, kind: input, shape index: {}]   ;;  %s2309_s6 = inlined_call_operand.vmem [shape: f32[1,128], index: 6, kind: input, shape index: {}]   ;;  %s2310_s7 = inlined_call_operand.hbm [shape: f32[8,8,128], index: 7, kind: output, shape index: {0}]   ;;  %s2311_s8 = inlined_call_operand.hbm [shape: f32[8,128], index: 8, kind: output, shape index: {1}]  }
   0x1   :  { %15 = vsyncpa [#allocation8], 0 }
   0x2   :  { %16 = vsyncpa [#allocation11], 0 }
   0x3   :  { %17 = vsyncpa [#allocation6], 0 }
   0x4   :  { %18 = vsyncpa [#allocation14], 0  ;;  %s1945_s27 = smov [#allocation7]   ;;  %s1946_s29 = smov [#allocation4]  }
   0x5   :  { %s36_s28 = sshll.u32 %s1945_s27, 4  ;;  %s24_s30 = sshll.u32 %s1946_s29, 4  ;;  %s37_s28 = int_to_ptr.vmem [resolvable:$true] %s36_s28  ;;  %s2001_s30 = int_to_ptr.vmem [resolvable:$true] %s24_s30 }
   0x6   :  { %s1803_s11 = scalar_lea.hbm %s2304_s1, 2048 }
   0x7   :  { %p1804_p0 = scmp.ne.s32.totalorder %s2304_s1, %s1803_s11  ;;  %p1807_p1 = scmp.lt.u32.totalorder %s1803_s11, %s2304_s1 }
   0x9   :  { %p1809_p2 = pnand %p1807_p1, %p1804_p0 }
   0xb   :  { %1812 = shalt.err (!%p1809_p2)
}
   0xc   :  { %s1813_s16 = scalar_lea.vmem %s37_s28, 2048  ;;  %p1818_p4 = scmp.lt.s32.totalorder %s37_s28, %s37_s28 }
   0xd   :  { %p1814_p3 = scmp.ne.s32.totalorder %s37_s28, %s1813_s16  ;;  %p1819_p5 = scmp.lt.s32.totalorder %s1813_s16, %s1813_s16 }
   0xf   :  { %p1820_p6 = por %p1819_p5, %p1818_p4 }
  0x11   :  { %p1821_p7 = pnand %p1820_p6, %p1814_p3 }
  0x13   :  { %1824 = shalt.err (!%p1821_p7)
}
  0x14   :  { %s1947_s17 = smov 128   ;;  %s1948_s18 = smov 8  }
  0x15   :  { %42 = dma.hbm_to_vmem [thread:$0]  %s2304_s1, 2048, %s37_s28, [#allocation8], %s1947_s17, %s1947_s17, %s1948_s18  }
  0x16   :  { %s1825_s23 = scalar_lea.hbm %s2303_s0, 1024 }
  0x17   :  { %p1826_p8 = scmp.ne.s32.totalorder %s2303_s0, %s1825_s23  ;;  %p1829_p9 = scmp.lt.u32.totalorder %s1825_s23, %s2303_s0 }
  0x19   :  { %p1831_p10 = pnand %p1829_p9, %p1826_p8 }
  0x1b   :  { %1834 = shalt.err (!%p1831_p10)
}
  0x1c   :  { %s1835_s29 = scalar_lea.vmem %s2001_s30, 1024  ;;  %p1840_p12 = scmp.lt.s32.totalorder %s2001_s30, %s2001_s30 }
  0x1d   :  { %p1836_p11 = scmp.ne.s32.totalorder %s2001_s30, %s1835_s29  ;;  %p1841_p13 = scmp.lt.s32.totalorder %s1835_s29, %s1835_s29 }
  0x1f   :  { %p1842_p0 = por %p1841_p13, %p1840_p12 }
  0x21   :  { %p1843_p1 = pnand %p1842_p0, %p1836_p11 }
  0x23   :  { %1846 = shalt.err (!%p1843_p1)
}
  0x24   :  { %30 = dma.hbm_to_vmem [thread:$0]  %s2303_s0, 1024, %s2001_s30, [#allocation5], %s1947_s17, %s1947_s17, %s1948_s18  }
  0x25   :  { %s1949_s9 = smov [#allocation9]   ;;  %s1950_s11 = smov [#allocation10]  }
  0x26   :  { %s50_s10 = sshll.u32 %s1949_s9, 4  ;;  %s64_s12 = sshll.u32 %s1950_s11, 4  ;;  %s51_s10 = int_to_ptr.vmem [resolvable:$true] %s50_s10  ;;  %s2038_s12 = int_to_ptr.vmem [resolvable:$true] %s64_s12 }
  0x27   :  { %s1847_s15 = scalar_lea.hbm %s2306_s3, 2048 }
  0x28   :  { %p1848_p2 = scmp.ne.s32.totalorder %s2306_s3, %s1847_s15  ;;  %p1851_p3 = scmp.lt.u32.totalorder %s1847_s15, %s2306_s3 }
  0x2a   :  { %p1853_p4 = pnand %p1851_p3, %p1848_p2 }
  0x2c   :  { %1856 = shalt.err (!%p1853_p4)
}
  0x2d   :  { %s1857_s0 = scalar_lea.vmem %s51_s10, 2048  ;;  %p1862_p6 = scmp.lt.s32.totalorder %s51_s10, %s51_s10 }
  0x2e   :  { %p1858_p5 = scmp.ne.s32.totalorder %s51_s10, %s1857_s0  ;;  %p1863_p7 = scmp.lt.s32.totalorder %s1857_s0, %s1857_s0 }
  0x30   :  { %p1864_p8 = por %p1863_p7, %p1862_p6 }
  0x32   :  { %p1865_p9 = pnand %p1864_p8, %p1858_p5 }
  0x34   :  { %1868 = shalt.err (!%p1865_p9)
}
  0x35   :  { %56 = dma.hbm_to_vmem [thread:$0]  %s2306_s3, 2048, %s51_s10, [#allocation8], %s1947_s17, %s1947_s17, %s1948_s18  }
  0x36   :  { %s1869_s25 = scalar_lea.hbm %s2308_s5, 2048 }
  0x37   :  { %p1870_p10 = scmp.ne.s32.totalorder %s2308_s5, %s1869_s25  ;;  %p1873_p11 = scmp.lt.u32.totalorder %s1869_s25, %s2308_s5 }
  0x39   :  { %p1875_p12 = pnand %p1873_p11, %p1870_p10 }
  0x3b   :  { %1878 = shalt.err (!%p1875_p12)
}
  0x3c   :  { %s1879_s28 = scalar_lea.vmem %s2038_s12, 2048  ;;  %p1884_p0 = scmp.lt.s32.totalorder %s2038_s12, %s2038_s12 }
  0x3d   :  { %p1880_p13 = scmp.ne.s32.totalorder %s2038_s12, %s1879_s28  ;;  %p1885_p1 = scmp.lt.s32.totalorder %s1879_s28, %s1879_s28 }
  0x3f   :  { %p1886_p2 = por %p1885_p1, %p1884_p0 }
  0x41   :  { %p1887_p3 = pnand %p1886_p2, %p1880_p13 }
  0x43   :  { %1890 = shalt.err (!%p1887_p3)
}
  0x44   :  { %70 = dma.hbm_to_vmem [thread:$0]  %s2308_s5, 2048, %s2038_s12, [#allocation11], %s1947_s17, %s1947_s17, %s1948_s18  }
  0x45   :  { %1935 = dma.done.wait [#allocation5], 1024  }
  0x46   :  { %1936 = vsyncadd [#allocation5], 4294966272 }
  0x47   :  { %1937 = dma.done.wait [#allocation8], 4096  }
  0x48   :  { %1938 = vsyncadd [#allocation8], 4294963200 }
  0x49   :  { %1939 = dma.done.wait [#allocation11], 2048  }
  0x4a   :  { %1940 = vsyncadd [#allocation11], 4294965248  ;;  %v1951_v0 = vmov 0.0|0.0   ;;  %vm1952_vm0 = vmmov 0   ;;  %v1953_v1 = vmov 0.0   ;;  %v99_v2 = vld [vmem:[#allocation7] sm:$0xff] }
  0x4b   :  { %1560 = vmatprep.subr.bf16.mxu1 %v1951_v0  ;;  %1245 = vmatprep.mubr.msk.f32.mxu1 %vm1952_vm0, %v1953_v1  ;;  %v100_v3 = vld [vmem:[#allocation7 + $0x8] sm:$0xff]  ;;  %v235_v4 = vld [vmem:[#allocation9] sm:$0xff]  ;;  %v101_v7 = vld [vmem:[#allocation7 + $0x10] sm:$0xff] }
  0x4c   :  { %v1528_v5 = vpack.c.bf16 %v100_v3, %v99_v2  ;;  %v236_v6 = vld [vmem:[#allocation9 + $0x8] sm:$0xff]  ;;  %v102_v8 = vld [vmem:[#allocation7 + $0x18] sm:$0xff]  ;;  %v237_v11 = vld [vmem:[#allocation9 + $0x10] sm:$0xff] }
  0x4d   :  { %v2078_v9 = vpack.c.bf16 %v236_v6, %v235_v4  ;;  %v1532_v10 = vpack.c.bf16 %v102_v8, %v101_v7  ;;  %v238_v12 = vld [vmem:[#allocation9 + $0x18] sm:$0xff]  ;;  %v103_v13 = vld [vmem:[#allocation7 + $0x20] sm:$0xff]  ;;  %v104_v14 = vld [vmem:[#allocation7 + $0x28] sm:$0xff] }
  0x4e   :  { %1529 = vmatprep.subr.bf16.mxu0 %v1528_v5  ;;  %v2081_v15 = vpack.c.bf16 %v238_v12, %v237_v11  ;;  %v1536_v16 = vpack.c.bf16 %v104_v14, %v103_v13  ;;  %v239_v17 = vld [vmem:[#allocation9 + $0x20] sm:$0xff]  ;;  %v240_v18 = vld [vmem:[#allocation9 + $0x28] sm:$0xff]  ;;  %v105_v19 = vld [vmem:[#allocation7 + $0x30] sm:$0xff] }
  0x4f   :  { %1531 = vmatpush3.bf16.msra.mxu0 %v1528_v5  ;;  %1562 = vmatpush3.bf16.msra.mxu1 %v2078_v9  ;;  %v106_v20 = vld [vmem:[#allocation7 + $0x38] sm:$0xff]  ;;  %v2085_v21 = vpack.c.bf16 %v240_v18, %v239_v17  ;;  %v241_v23 = vld [vmem:[#allocation9 + $0x30] sm:$0xff]  ;;  %v107_v25 = vld [vmem:[#allocation7 + $0x40] sm:$0xff] }
  0x50   :  { %1533 = vmatprep.subr.bf16.mxu0 %v1532_v10  ;;  %1563 = vmatprep.subr.bf16.mxu1 %v1951_v0  ;;  %v1540_v22 = vpack.c.bf16 %v106_v20, %v105_v19  ;;  %v242_v24 = vld [vmem:[#allocation9 + $0x38] sm:$0xff]  ;;  %v108_v26 = vld [vmem:[#allocation7 + $0x48] sm:$0xff]  ;;  %v91_v27 = vld [vmem:[#allocation4] sm:$0xff] }
  0x51   :  { %1201 = vmatprep.mubr.f32.mxu0 %v91_v27  ;;  %v2089_v28 = vpack.c.bf16 %v242_v24, %v241_v23  ;;  %v1544_v29 = vpack.c.bf16 %v108_v26, %v107_v25  ;;  %v243_v30 = vld [vmem:[#allocation9 + $0x40] sm:$0xff]  ;;  %v244_v31 = vld [vmem:[#allocation9 + $0x48] sm:$0xff]  ;;  %v109_v32 = vld [vmem:[#allocation7 + $0x50] sm:$0xff] }
  0x52   :  { %v110_v33 = vld [vmem:[#allocation7 + $0x58] sm:$0xff]  ;;  %v2093_v34 = vpack.c.bf16 %v244_v31, %v243_v30  ;;  %v245_v36 = vld [vmem:[#allocation9 + $0x50] sm:$0xff]  ;;  %v111_v38 = vld [vmem:[#allocation7 + $0x60] sm:$0xff] }
  0x53   :  { %1535 = vmatpush3.bf16.msra.mxu0 %v1532_v10  ;;  %1565 = vmatpush3.bf16.msra.mxu1 %v2081_v15  ;;  %v1548_v35 = vpack.c.bf16 %v110_v33, %v109_v32  ;;  %v246_v37 = vld [vmem:[#allocation9 + $0x58] sm:$0xff]  ;;  %v112_v39 = vld [vmem:[#allocation7 + $0x68] sm:$0xff]  ;;  %v247_v42 = vld [vmem:[#allocation9 + $0x60] sm:$0xff] }
  0x54   :  { %1537 = vmatprep.subr.bf16.mxu0 %v1536_v16  ;;  %1566 = vmatprep.subr.bf16.mxu1 %v1951_v0  ;;  %v2097_v40 = vpack.c.bf16 %v246_v37, %v245_v36  ;;  %v1552_v41 = vpack.c.bf16 %v112_v39, %v111_v38  ;;  %v248_v43 = vld [vmem:[#allocation9 + $0x68] sm:$0xff]  ;;  %v113_v44 = vld [vmem:[#allocation7 + $0x70] sm:$0xff]  ;;  %v114_v45 = vld [vmem:[#allocation7 + $0x78] sm:$0xff] }
  0x55   :  { %v2101_v46 = vpack.c.bf16 %v248_v43, %v247_v42  ;;  %v1556_v47 = vpack.c.bf16 %v114_v45, %v113_v44  ;;  %v249_v48 = vld [vmem:[#allocation9 + $0x70] sm:$0xff]  ;;  %v250_v49 = vld [vmem:[#allocation9 + $0x78] sm:$0xff]  ;;  %v92_v51 = vld [vmem:[#allocation4 + $0x8] sm:$0xff] }
  0x56   :  { %v2105_v50 = vpack.c.bf16 %v250_v49, %v249_v48  ;;  %v89_v52 = vld [vmem:[%s2307_s4] sm:$0xff]  ;;  %v93_v53 = vld [vmem:[#allocation4 + $0x10] sm:$0xff]  ;;  %v94_v54 = vld [vmem:[#allocation4 + $0x18] sm:$0xff] }
  0x57   :  { %1539 = vmatpush3.bf16.msra.mxu0 %v1536_v16  ;;  %1568 = vmatpush3.bf16.msra.mxu1 %v2085_v21  ;;  %v95_v55 = vld [vmem:[#allocation4 + $0x20] sm:$0xff]  ;;  %v96_v56 = vld [vmem:[#allocation4 + $0x28] sm:$0xff]  ;;  %v97_v57 = vld [vmem:[#allocation4 + $0x30] sm:$0xff] }
  0x58   :  { %1541 = vmatprep.subr.bf16.mxu0 %v1540_v22  ;;  %1569 = vmatprep.subr.bf16.mxu1 %v1951_v0  ;;  %v98_v58 = vld [vmem:[#allocation4 + $0x38] sm:$0xff]  ;;  %v2153_v59 = vld [vmem:[%s2305_s2] ss:$0 sm:$0xff]  ;;  %v864_v37 = vld [vmem:[#allocation10 + $0x8] sm:$0xff]  ;;  %s1954_s2 = smov [#allocation12]  }
  0x59   :  { %v863_v36 = vld [vmem:[#allocation10] sm:$0xff]  ;;  %v865_v38 = vld [vmem:[#allocation10 + $0x10] sm:$0xff]  ;;  %v868_v43 = vld [vmem:[#allocation10 + $0x28] sm:$0xff]  ;;  %s962_s12 = sshll.u32 %s1954_s2, 4  ;;  %s963_s12 = int_to_ptr.vmem [resolvable:$true] %s962_s12 }
  0x5a   :  { %v1753_v39 = vpack.c.bf16 %v864_v37, %v863_v36  ;;  %v867_v42 = vld [vmem:[#allocation10 + $0x20] sm:$0xff]  ;;  %v869_v45 = vld [vmem:[#allocation10 + $0x30] sm:$0xff]  ;;  %v872_v48 = vld [vmem:[#allocation10 + $0x48] sm:$0xff]  ;;  %s1891_s13 = scalar_lea.vmem %s963_s12, 1024  ;;  %p1896_p5 = scmp.lt.s32.totalorder %s963_s12, %s963_s12 }
  0x5b   :  { %1543 = vmatpush3.bf16.msra.mxu0 %v1540_v22  ;;  %1571 = vmatpush3.bf16.msra.mxu1 %v2089_v28  ;;  %v1759_v44 = vpack.c.bf16 %v868_v43, %v867_v42  ;;  %p1892_p4 = scmp.ne.s32.totalorder %s963_s12, %s1891_s13  ;;  %p1897_p6 = scmp.lt.s32.totalorder %s1891_s13, %s1891_s13 }
  0x5c   :  { %1545 = vmatprep.subr.bf16.mxu0 %v1544_v29  ;;  %1572 = vmatprep.subr.bf16.mxu1 %v1951_v0 }
  0x5d   :  { %p1898_p7 = por %p1897_p6, %p1896_p5 }
  0x5f   :  { %1547 = vmatpush3.bf16.msra.mxu0 %v1544_v29  ;;  %1574 = vmatpush3.bf16.msra.mxu1 %v2093_v34  ;;  %p1899_p8 = pnand %p1898_p7, %p1892_p4 }
  0x60   :  { %1549 = vmatprep.subr.bf16.mxu0 %v1548_v35  ;;  %1575 = vmatprep.subr.bf16.mxu1 %v1951_v0 }
  0x63   :  { %1551 = vmatpush3.bf16.msra.mxu0 %v1548_v35  ;;  %1577 = vmatpush3.bf16.msra.mxu1 %v2097_v40 }
  0x64   :  { %1553 = vmatprep.subr.bf16.mxu0 %v1552_v41  ;;  %1578 = vmatprep.subr.bf16.mxu1 %v1951_v0 }
  0x67   :  { %1555 = vmatpush3.bf16.msra.mxu0 %v1552_v41  ;;  %1580 = vmatpush3.bf16.msra.mxu1 %v2101_v46 }
  0x68   :  { %1557 = vmatprep.subr.bf16.mxu0 %v1556_v47  ;;  %1581 = vmatprep.subr.bf16.mxu1 %v1951_v0 }
  0x6b   :  { %1559 = vmatpush3.bf16.msra.mxu0 %v1556_v47  ;;  %1583 = vmatpush3.bf16.msra.mxu1 %v2105_v50 }
  0x6c   :  { %1584 = vmatprep.subr.bf16.mxu0 %v1951_v0  ;;  %1608 = vmatprep.subr.bf16.mxu1 %v1951_v0 }
  0x6e   :  { %1202 = vmatmul.mubr.f32.vlgmr.msra.gmra.mrb[0].mxu0 %v92_v51  ;;  %1246 = vmatmul.mubr.f32.vlgmr.msra.gmra.mrb[0].mxu1 %v89_v52 }
  0x6f   :  { %1586 = vmatpush3.bf16.msra.mxu0 %v2078_v9  ;;  %1610 = vmatpush3.bf16.msra.mxu1 %v2078_v9 }
  0x70   :  { %1587 = vmatprep.subr.bf16.mxu0 %v1951_v0  ;;  %1611 = vmatprep.subr.bf16.mxu1 %v1951_v0 }
  0x71   :  { %1315 = vmatprep.mubr.msk.f32.mxu1 %vm1952_vm0, %v1953_v1  ;;  %1204 = vmatprep.mubr.f32.mxu0 %v93_v53 }
  0x72   :  { %1205 = vmatmul.mubr.f32.gmra.mrb[2].mxu0 %v94_v54 }
  0x73   :  { %1589 = vmatpush3.bf16.msra.mxu0 %v2081_v15  ;;  %1613 = vmatpush3.bf16.msra.mxu1 %v2081_v15 }
  0x74   :  { %1590 = vmatprep.subr.bf16.mxu0 %v1951_v0  ;;  %1614 = vmatprep.subr.bf16.mxu1 %v1951_v0 }
  0x75   :  { %1207 = vmatprep.mubr.f32.mxu0 %v95_v55  ;;  %v873_v55 = vld [vmem:[#allocation10 + $0x50] sm:$0xff] }
  0x76   :  { %1208 = vmatmul.mubr.f32.gmra.mrb[4].mxu0 %v96_v56  ;;  %v874_v56 = vld [vmem:[#allocation10 + $0x58] sm:$0xff] }
  0x77   :  { %1592 = vmatpush3.bf16.msra.mxu0 %v2085_v21  ;;  %1616 = vmatpush3.bf16.msra.mxu1 %v2085_v21 }
  0x78   :  { %1593 = vmatprep.subr.bf16.mxu0 %v1951_v0  ;;  %1617 = vmatprep.subr.bf16.mxu1 %v1951_v0 }
  0x79   :  { %1210 = vmatprep.mubr.f32.mxu0 %v97_v57  ;;  %v1768_v57 = vpack.c.bf16 %v874_v56, %v873_v55 }
  0x7a   :  { %1211 = vmatmul.mubr.f32.gmra.mrb[6].mxu0 %v98_v58  ;;  %v875_v58 = vld [vmem:[#allocation10 + $0x60] sm:$0xff] }
  0x7b   :  { %1595 = vmatpush3.bf16.msra.mxu0 %v2089_v28  ;;  %1619 = vmatpush3.bf16.msra.mxu1 %v2089_v28 }
  0x7c   :  { %1596 = vmatprep.subr.bf16.mxu0 %v1951_v0  ;;  %1620 = vmatprep.subr.bf16.mxu1 %v1951_v0 }
  0x7d   :  { %1280 = vmatprep.mubr.msk.f32.mxu0 %vm1952_vm0, %v1953_v1 }
  0x7f   :  { %1598 = vmatpush3.bf16.msra.mxu0 %v2093_v34  ;;  %1622 = vmatpush3.bf16.msra.mxu1 %v2093_v34 }
  0x80   :  { %1599 = vmatprep.subr.bf16.mxu0 %v1951_v0  ;;  %1623 = vmatprep.subr.bf16.mxu1 %v1951_v0 }
  0x83   :  { %1601 = vmatpush3.bf16.msra.mxu0 %v2097_v40  ;;  %1625 = vmatpush3.bf16.msra.mxu1 %v2097_v40 }
  0x84   :  { %1602 = vmatprep.subr.bf16.mxu0 %v1951_v0  ;;  %1626 = vmatprep.subr.bf16.mxu1 %v1951_v0 }
  0x87   :  { %1604 = vmatpush3.bf16.msra.mxu0 %v2101_v46  ;;  %1628 = vmatpush3.bf16.msra.mxu1 %v2101_v46 }
  0x88   :  { %1605 = vmatprep.subr.bf16.mxu0 %v1951_v0  ;;  %1629 = vmatprep.subr.bf16.mxu1 %v1951_v0 }
  0x8b   :  { %1607 = vmatpush3.bf16.msra.mxu0 %v2105_v50  ;;  %1631 = vmatpush3.bf16.msra.mxu1 %v2105_v50 }
  0x8c   :  { %1632 = vmatprep.subr.bf16.mxu0 %v1951_v0  ;;  %1656 = vmatprep.subr.bf16.mxu1 %v1951_v0 }
 0x141   :  { %v1203_v60 = vpop.f32.mrb[0].mxu0  ;;  %v319_v61 = vpop.f32.mrb[0].mxu1 }
 0x142   :  { %v188_v62 = vpop.f32.mrb[1].mxu0  ;;  %v1247_v63 = vpop.f32.mrb[1].mxu1  ;;  %v194_v12 = vadd.f32 %v1203_v60, %v2153_v59  ;;  %v876_v60 = vld [vmem:[#allocation10 + $0x68] sm:$0xff] }
 0x143   :  { %v189_v2 = vadd.f32 %v2153_v59, %v188_v62  ;;  %v877_v62 = vld [vmem:[#allocation10 + $0x70] sm:$0xff]  ;;  %v878_v63 = vld [vmem:[#allocation10 + $0x78] sm:$0xff] }
 0x145   :  { %v323_v3 = vadd.f32 %v319_v61, %v189_v2  ;;  %v1206_v5 = vpop.f32.mrb[2].mxu0  ;;  %v1771_v61 = vpack.c.bf16 %v876_v60, %v875_v58  ;;  %v1774_v2 = vpack.c.bf16 %v878_v63, %v877_v62 }
 0x146   :  { %v198_v6 = vpop.f32.mrb[3].mxu0  ;;  %v204_v24 = vadd.f32 %v1206_v5, %v2153_v59 }
 0x147   :  { %1787 = vtanh.f32 %v323_v3  ;;  %v199_v18 = vadd.f32 %v2153_v59, %v198_v6 }
 0x149   :  { %v2174_v7 = vpop.f32.mrb[4].mxu0 }
 0x14a   :  { %v2176_v8 = vpop.f32.mrb[5].mxu0 }
 0x14b   :  { %v209_v30 = vadd.f32 %v2153_v59, %v2176_v8 }
 0x14d   :  { %v2178_v10 = vpop.f32.mrb[6].mxu0 }
 0x14e   :  { %v2180_v11 = vpop.f32.mrb[7].mxu0  ;;  %v224_v3 = vadd.f32 %v2178_v10, %v2153_v59 }
 0x151   :  { %v1788_v4 = vpop.eup %1787 }
 0x152   :  { %325 = vst [vmem:[#allocation12] sm:$0xff] %v1788_v4  ;;  %1281 = vmatmul.mubr.f32.vlgmr.msra.gmra.mrb[8].mxu0 %v1788_v4 }
 0x153   :  { %1634 = vmatpush3.bf16.msra.mxu0 %v2078_v9  ;;  %1350 = vmatprep.mubr.msk.f32.mxu0 %vm1952_vm0, %v1953_v1 }
 0x154   :  { %1635 = vmatprep.subr.bf16.mxu0 %v1951_v0 }
 0x157   :  { %1637 = vmatpush3.bf16.msra.mxu0 %v2081_v15 }
 0x158   :  { %1638 = vmatprep.subr.bf16.mxu0 %v1951_v0 }
 0x15b   :  { %1640 = vmatpush3.bf16.msra.mxu0 %v2085_v21 }
 0x15c   :  { %1641 = vmatprep.subr.bf16.mxu0 %v1951_v0 }
 0x15f   :  { %1643 = vmatpush3.bf16.msra.mxu0 %v2089_v28 }
 0x160   :  { %1644 = vmatprep.subr.bf16.mxu0 %v1951_v0 }
 0x163   :  { %1646 = vmatpush3.bf16.msra.mxu0 %v2093_v34 }
 0x164   :  { %1647 = vmatprep.subr.bf16.mxu0 %v1951_v0 }
 0x167   :  { %1649 = vmatpush3.bf16.msra.mxu0 %v2097_v40 }
 0x168   :  { %1650 = vmatprep.subr.bf16.mxu0 %v1951_v0 }
 0x16b   :  { %1652 = vmatpush3.bf16.msra.mxu0 %v2101_v46 }
 0x16c   :  { %1653 = vmatprep.subr.bf16.mxu0 %v1951_v0 }
 0x16f   :  { %1655 = vmatpush3.bf16.msra.mxu0 %v2105_v50 }
 0x170   :  { %1680 = vmatprep.subr.bf16.mxu0 %v1951_v0 }
 0x225   :  { %v394_v13 = vpop.f32.mrb[8].mxu0 }
 0x226   :  { %v398_v14 = vadd.f32 %v394_v13, %v194_v12  ;;  %v1282_v16 = vpop.f32.mrb[9].mxu0 }
 0x228   :  { %1789 = vtanh.f32 %v398_v14 }
 0x232   :  { %v1790_v17 = vpop.eup %1789 }
 0x233   :  { %401 = vst [vmem:[#allocation12 + $0x8] sm:$0xff] %v1790_v17  ;;  %1316 = vmatmul.mubr.f32.vlgmr.msra.gmra.mrb[2].mxu1 %v1790_v17 }
 0x234   :  { %1658 = vmatpush3.bf16.msra.mxu1 %v2078_v9  ;;  %1385 = vmatprep.mubr.msk.f32.mxu1 %vm1952_vm0, %v1953_v1 }
 0x235   :  { %1659 = vmatprep.subr.bf16.mxu1 %v1951_v0 }
 0x238   :  { %1661 = vmatpush3.bf16.msra.mxu1 %v2081_v15 }
 0x239   :  { %1662 = vmatprep.subr.bf16.mxu1 %v1951_v0 }
 0x23c   :  { %1664 = vmatpush3.bf16.msra.mxu1 %v2085_v21 }
 0x23d   :  { %1665 = vmatprep.subr.bf16.mxu1 %v1951_v0 }
 0x240   :  { %1667 = vmatpush3.bf16.msra.mxu1 %v2089_v28 }
 0x241   :  { %1668 = vmatprep.subr.bf16.mxu1 %v1951_v0 }
 0x244   :  { %1670 = vmatpush3.bf16.msra.mxu1 %v2093_v34 }
 0x245   :  { %1671 = vmatprep.subr.bf16.mxu1 %v1951_v0 }
 0x248   :  { %1673 = vmatpush3.bf16.msra.mxu1 %v2097_v40 }
 0x249   :  { %1674 = vmatprep.subr.bf16.mxu1 %v1951_v0 }
 0x24c   :  { %1676 = vmatpush3.bf16.msra.mxu1 %v2101_v46 }
 0x24d   :  { %1677 = vmatprep.subr.bf16.mxu1 %v1951_v0 }
 0x250   :  { %1679 = vmatpush3.bf16.msra.mxu1 %v2105_v50 }
 0x251   :  { %1704 = vmatprep.subr.bf16.mxu1 %v1951_v0 }
 0x306   :  { %v470_v19 = vpop.f32.mrb[2].mxu1 }
 0x307   :  { %v474_v20 = vadd.f32 %v470_v19, %v199_v18  ;;  %v1317_v22 = vpop.f32.mrb[3].mxu1 }
 0x309   :  { %1791 = vtanh.f32 %v474_v20 }
 0x313   :  { %v1792_v23 = vpop.eup %1791 }
 0x314   :  { %477 = vst [vmem:[#allocation12 + $0x10] sm:$0xff] %v1792_v23  ;;  %1351 = vmatmul.mubr.f32.vlgmr.msra.gmra.mrb[10].mxu0 %v1792_v23 }
 0x315   :  { %1682 = vmatpush3.bf16.msra.mxu0 %v2078_v9  ;;  %1420 = vmatprep.mubr.msk.f32.mxu0 %vm1952_vm0, %v1953_v1 }
 0x316   :  { %1683 = vmatprep.subr.bf16.mxu0 %v1951_v0 }
 0x319   :  { %1685 = vmatpush3.bf16.msra.mxu0 %v2081_v15 }
 0x31a   :  { %1686 = vmatprep.subr.bf16.mxu0 %v1951_v0 }
 0x31d   :  { %1688 = vmatpush3.bf16.msra.mxu0 %v2085_v21 }
 0x31e   :  { %1689 = vmatprep.subr.bf16.mxu0 %v1951_v0 }
 0x321   :  { %1691 = vmatpush3.bf16.msra.mxu0 %v2089_v28 }
 0x322   :  { %1692 = vmatprep.subr.bf16.mxu0 %v1951_v0 }
 0x325   :  { %1694 = vmatpush3.bf16.msra.mxu0 %v2093_v34 }
 0x326   :  { %1695 = vmatprep.subr.bf16.mxu0 %v1951_v0 }
 0x329   :  { %1697 = vmatpush3.bf16.msra.mxu0 %v2097_v40 }
 0x32a   :  { %1698 = vmatprep.subr.bf16.mxu0 %v1951_v0 }
 0x32d   :  { %1700 = vmatpush3.bf16.msra.mxu0 %v2101_v46 }
 0x32e   :  { %1701 = vmatprep.subr.bf16.mxu0 %v1951_v0 }
 0x331   :  { %1703 = vmatpush3.bf16.msra.mxu0 %v2105_v50 }
 0x332   :  { %1728 = vmatprep.subr.bf16.mxu0 %v1951_v0 }
 0x3e7   :  { %v546_v25 = vpop.f32.mrb[10].mxu0 }
 0x3e8   :  { %v550_v26 = vadd.f32 %v546_v25, %v204_v24  ;;  %v1352_v27 = vpop.f32.mrb[11].mxu0 }
 0x3ea   :  { %1793 = vtanh.f32 %v550_v26 }
 0x3f4   :  { %v1794_v29 = vpop.eup %1793 }
 0x3f5   :  { %553 = vst [vmem:[#allocation12 + $0x18] sm:$0xff] %v1794_v29  ;;  %1386 = vmatmul.mubr.f32.vlgmr.msra.gmra.mrb[4].mxu1 %v1794_v29 }
 0x3f6   :  { %1706 = vmatpush3.bf16.msra.mxu1 %v2078_v9  ;;  %1455 = vmatprep.mubr.msk.f32.mxu1 %vm1952_vm0, %v1953_v1 }
 0x3f7   :  { %1707 = vmatprep.subr.bf16.mxu1 %v1951_v0 }
 0x3fa   :  { %1709 = vmatpush3.bf16.msra.mxu1 %v2081_v15 }
 0x3fb   :  { %1710 = vmatprep.subr.bf16.mxu1 %v1951_v0 }
 0x3fe   :  { %1712 = vmatpush3.bf16.msra.mxu1 %v2085_v21 }
 0x3ff   :  { %1713 = vmatprep.subr.bf16.mxu1 %v1951_v0 }
 0x402   :  { %1715 = vmatpush3.bf16.msra.mxu1 %v2089_v28 }
 0x403   :  { %1716 = vmatprep.subr.bf16.mxu1 %v1951_v0 }
 0x406   :  { %1718 = vmatpush3.bf16.msra.mxu1 %v2093_v34 }
 0x407   :  { %1719 = vmatprep.subr.bf16.mxu1 %v1951_v0 }
 0x40a   :  { %1721 = vmatpush3.bf16.msra.mxu1 %v2097_v40 }
 0x40b   :  { %1722 = vmatprep.subr.bf16.mxu1 %v1951_v0 }
 0x40e   :  { %1724 = vmatpush3.bf16.msra.mxu1 %v2101_v46 }
 0x40f   :  { %1725 = vmatprep.subr.bf16.mxu1 %v1951_v0 }
 0x412   :  { %1727 = vmatpush3.bf16.msra.mxu1 %v2105_v50 }
 0x413   :  { %1752 = vmatprep.subr.bf16.mxu1 %v1951_v0 }
 0x4c8   :  { %v622_v31 = vpop.f32.mrb[4].mxu1 }
 0x4c9   :  { %v626_v32 = vadd.f32 %v622_v31, %v209_v30  ;;  %v1387_v33 = vpop.f32.mrb[5].mxu1 }
 0x4cb   :  { %1795 = vtanh.f32 %v626_v32 }
 0x4d5   :  { %v1796_v35 = vpop.eup %1795 }
 0x4d6   :  { %629 = vst [vmem:[#allocation12 + $0x20] sm:$0xff] %v1796_v35  ;;  %1421 = vmatmul.mubr.f32.vlgmr.msra.gmra.mrb[12].mxu0 %v1796_v35 }
 0x4d7   :  { %1730 = vmatpush3.bf16.msra.mxu0 %v2078_v9  ;;  %1490 = vmatprep.mubr.msk.f32.mxu0 %vm1952_vm0, %v1953_v1  ;;  %v214_v9 = vadd.f32 %v2174_v7, %v2153_v59 }
 0x4d8   :  { %1731 = vmatprep.subr.bf16.mxu0 %v1951_v0 }
 0x4db   :  { %1733 = vmatpush3.bf16.msra.mxu0 %v2081_v15 }
 0x4dc   :  { %1734 = vmatprep.subr.bf16.mxu0 %v1951_v0 }
 0x4df   :  { %1736 = vmatpush3.bf16.msra.mxu0 %v2085_v21 }
 0x4e0   :  { %1737 = vmatprep.subr.bf16.mxu0 %v1951_v0 }
 0x4e3   :  { %1739 = vmatpush3.bf16.msra.mxu0 %v2089_v28 }
 0x4e4   :  { %1740 = vmatprep.subr.bf16.mxu0 %v1951_v0 }
 0x4e7   :  { %1742 = vmatpush3.bf16.msra.mxu0 %v2093_v34 }
 0x4e8   :  { %1743 = vmatprep.subr.bf16.mxu0 %v1951_v0 }
 0x4eb   :  { %1745 = vmatpush3.bf16.msra.mxu0 %v2097_v40  ;;  %v866_v40 = vld [vmem:[#allocation10 + $0x18] sm:$0xff] }
 0x4ec   :  { %1746 = vmatprep.subr.bf16.mxu0 %v1951_v0  ;;  %v1756_v41 = vpack.c.bf16 %v866_v40, %v865_v38 }
 0x4ef   :  { %1748 = vmatpush3.bf16.msra.mxu0 %v2101_v46  ;;  %v870_v46 = vld [vmem:[#allocation10 + $0x38] sm:$0xff] }
 0x4f0   :  { %1749 = vmatprep.subr.bf16.mxu0 %v1951_v0  ;;  %v1762_v47 = vpack.c.bf16 %v870_v46, %v869_v45 }
 0x4f3   :  { %1751 = vmatpush3.bf16.msra.mxu0 %v2105_v50  ;;  %v219_v50 = vadd.f32 %v2153_v59, %v2180_v11 }
 0x5a9   :  { %v698_v15 = vpop.f32.mrb[12].mxu0 }
 0x5aa   :  { %v702_v21 = vadd.f32 %v698_v15, %v214_v9  ;;  %v1422_v28 = vpop.f32.mrb[13].mxu0 }
 0x5ac   :  { %1797 = vtanh.f32 %v702_v21 }
 0x5b6   :  { %v1798_v34 = vpop.eup %1797 }
 0x5b7   :  { %705 = vst [vmem:[#allocation12 + $0x28] sm:$0xff] %v1798_v34  ;;  %1456 = vmatmul.mubr.f32.vlgmr.msra.gmra.mrb[6].mxu1 %v1798_v34 }
 0x5b8   :  { %1525 = vmatprep.mubr.msk.f32.mxu1 %vm1952_vm0, %v1953_v1  ;;  %1754 = vmatpush3.bf16.msra.mxu1 %v1753_v39  ;;  %v871_v1 = vld [vmem:[#allocation10 + $0x40] sm:$0xff] }
 0x5b9   :  { %1755 = vmatprep.subr.bf16.mxu1 %v1951_v0  ;;  %v1765_v49 = vpack.c.bf16 %v872_v48, %v871_v1 }
 0x5bc   :  { %1757 = vmatpush3.bf16.msra.mxu1 %v1756_v41 }
 0x5bd   :  { %1758 = vmatprep.subr.bf16.mxu1 %v1951_v0 }
 0x5c0   :  { %1760 = vmatpush3.bf16.msra.mxu1 %v1759_v44 }
 0x5c1   :  { %1761 = vmatprep.subr.bf16.mxu1 %v1951_v0 }
 0x5c4   :  { %1763 = vmatpush3.bf16.msra.mxu1 %v1762_v47 }
 0x5c5   :  { %1764 = vmatprep.subr.bf16.mxu1 %v1951_v0 }
 0x5c8   :  { %1766 = vmatpush3.bf16.msra.mxu1 %v1765_v49 }
 0x5c9   :  { %1767 = vmatprep.subr.bf16.mxu1 %v1951_v0 }
 0x5cc   :  { %1769 = vmatpush3.bf16.msra.mxu1 %v1768_v57 }
 0x5cd   :  { %1770 = vmatprep.subr.bf16.mxu1 %v1951_v0 }
 0x5d0   :  { %1772 = vmatpush3.bf16.msra.mxu1 %v1771_v61 }
 0x5d1   :  { %1773 = vmatprep.subr.bf16.mxu1 %v1951_v0 }
 0x5d4   :  { %1775 = vmatpush3.bf16.msra.mxu1 %v1774_v2 }
 0x68a   :  { %v774_v51 = vpop.f32.mrb[6].mxu1 }
 0x68b   :  { %v778_v52 = vadd.f32 %v774_v51, %v219_v50  ;;  %v1457_v53 = vpop.f32.mrb[7].mxu1 }
 0x68d   :  { %1799 = vtanh.f32 %v778_v52 }
 0x697   :  { %v1800_v54 = vpop.eup %1799 }
 0x698   :  { %781 = vst [vmem:[#allocation12 + $0x30] sm:$0xff] %v1800_v54  ;;  %1491 = vmatmul.mubr.f32.vlgmr.msra.gmra.mrb[14].mxu0 %v1800_v54 }
 0x76b   :  { %v850_v4 = vpop.f32.mrb[14].mxu0 }
 0x76c   :  { %v854_v5 = vadd.f32 %v850_v4, %v224_v3  ;;  %v1492_v6 = vpop.f32.mrb[15].mxu0 }
 0x76e   :  { %1801 = vtanh.f32 %v854_v5 }
 0x778   :  { %v1802_v7 = vpop.eup %1801 }
 0x779   :  { %857 = vst [vmem:[#allocation12 + $0x38] sm:$0xff] %v1802_v7  ;;  %1526 = vmatmul.mubr.f32.vlgmr.msra.gmra.mrb[8].mxu1 %v1802_v7 }
 0x77a   :  { %1902 = shalt.err (!%p1899_p8)
}
 0x77b   :  { %s1903_s16 = scalar_lea.hbm %s2310_s7, 1024 }
 0x77c   :  { %p1904_p9 = scmp.ne.s32.totalorder %s2310_s7, %s1903_s16  ;;  %p1907_p10 = scmp.lt.u32.totalorder %s1903_s16, %s2310_s7 }
 0x77e   :  { %p1909_p11 = pnand %p1907_p10, %p1904_p9 }
 0x780   :  { %1912 = shalt.err (!%p1909_p11)
}
 0x781   :  { %968 = dma.vmem_to_hbm [thread:$0]  %s963_s12, 1024, %s2310_s7, [#allocation6], %s1947_s17, %s1947_s17, %s1948_s18  }
 0x782   :  { %v991_v0 = vld [vmem:[%s2309_s6] ss:$0 sm:$0xff]  ;;  %s1955_s25 = smov [#allocation13]  }
 0x783   :  { %s975_s26 = sshll.u32 %s1955_s25, 4  ;;  %s976_s26 = int_to_ptr.vmem [resolvable:$true] %s975_s26 }
 0x784   :  { %s1913_s27 = scalar_lea.vmem %s976_s26, 128  ;;  %p1918_p13 = scmp.lt.s32.totalorder %s976_s26, %s976_s26 }
 0x785   :  { %p1914_p12 = scmp.ne.s32.totalorder %s976_s26, %s1913_s27  ;;  %p1919_p0 = scmp.lt.s32.totalorder %s1913_s27, %s1913_s27 }
 0x787   :  { %p1920_p1 = por %p1919_p0, %p1918_p13 }
 0x789   :  { %p1921_p2 = pnand %p1920_p1, %p1914_p12 }
 0x84c   :  { %v952_v59 = vpop.f32.mrb[8].mxu1 }
 0x84d   :  { %v953_v8 = vadd.f32 %v991_v0, %v952_v59  ;;  %v1527_v10 = vpop.f32.mrb[9].mxu1 }
 0x84f   :  { %956 = vst [vmem:[#allocation13] sm:$0xff] %v953_v8 }
 0x850   :  { %1924 = shalt.err (!%p1921_p2)
}
 0x851   :  { %s1925_s17 = scalar_lea.hbm %s2311_s8, 128 }
 0x852   :  { %p1926_p3 = scmp.ne.s32.totalorder %s2311_s8, %s1925_s17  ;;  %p1929_p4 = scmp.lt.u32.totalorder %s1925_s17, %s2311_s8 }
 0x854   :  { %p1931_p5 = pnand %p1929_p4, %p1926_p3 }
 0x856   :  { %1934 = shalt.err (!%p1931_p5)
}
 0x857   :  { %978 = dma.vmem_to_hbm [thread:$0]  %s976_s26, 128, %s2311_s8, [#allocation14]  }
 0x858   :  { %1941 = dma.done.wait [#allocation6], 1024  }
 0x859   :  { %1942 = vsyncadd [#allocation6], 4294966272 }
 0x85a   :  { %1943 = dma.done.wait [#allocation14], 128  }
 0x85b   :  { %1944 = vsyncadd [#allocation14], 4294967168 }
 0x85c   :  { %985 = vsyncpa [#allocation5], 1 }
 0x85d   :  { %986 = vsyncpa [#allocation8], 1 }
 0x85e   :  { %987 = vsyncpa [#allocation11], 1 }
 0x85f   :  { %988 = vsyncpa [#allocation6], 1 }
 0x860   :  { %989 = vsyncpa [#allocation14], 1 }

// kernel: tpu_custom_call.1
= control target key start
LH: loop header
LB: loop body
LE: loop exit
PB: predicated region body
PF: predicated region fallthrough
CT: control target
= control target key end

     0   :  { %14 = vsyncpa [#allocation5], 0  ;;  %s2303_s0 = inlined_call_operand.hbm [shape: f32[8,8,128], index: 0, kind: input, shape index: {}]   ;;  %s2304_s1 = inlined_call_operand.hbm [shape: f32[128,128], index: 1, kind: input, shape index: {}]   ;;  %s2305_s2 = inlined_call_operand.vmem [shape: f32[1,128], index: 2, kind: input, shape index: {}]   ;;  %s2306_s3 = inlined_call_operand.hbm [shape: f32[128,128], index: 3, kind: input, shape index: {}]   ;;  %s2307_s4 = inlined_call_operand.vmem [shape: f32[8,128], index: 4, kind: input, shape index: {}]   ;;  %s2308_s5 = inlined_call_operand.hbm [shape: f32[128,128], index: 5, kind: input, shape index: {}]   ;;  %s2309_s6 = inlined_call_operand.vmem [shape: f32[1,128], index: 6, kind: input, shape index: {}]   ;;  %s2310_s7 = inlined_call_operand.hbm [shape: f32[8,8,128], index: 7, kind: output, shape index: {0}]   ;;  %s2311_s8 = inlined_call_operand.hbm [shape: f32[8,128], index: 8, kind: output, shape index: {1}]  }
   0x1   :  { %15 = vsyncpa [#allocation8], 0 }
   0x2   :  { %16 = vsyncpa [#allocation11], 0 }
   0x3   :  { %17 = vsyncpa [#allocation6], 0 }
   0x4   :  { %18 = vsyncpa [#allocation14], 0  ;;  %s1945_s27 = smov [#allocation7]   ;;  %s1946_s29 = smov [#allocation4]  }
   0x5   :  { %s36_s28 = sshll.u32 %s1945_s27, 4  ;;  %s24_s30 = sshll.u32 %s1946_s29, 4  ;;  %s37_s28 = int_to_ptr.vmem [resolvable:$true] %s36_s28  ;;  %s2001_s30 = int_to_ptr.vmem [resolvable:$true] %s24_s30 }
   0x6   :  { %s1803_s11 = scalar_lea.hbm %s2304_s1, 2048 }
   0x7   :  { %p1804_p0 = scmp.ne.s32.totalorder %s2304_s1, %s1803_s11  ;;  %p1807_p1 = scmp.lt.u32.totalorder %s1803_s11, %s2304_s1 }
   0x9   :  { %p1809_p2 = pnand %p1807_p1, %p1804_p0 }
   0xb   :  { %1812 = shalt.err (!%p1809_p2)
}
   0xc   :  { %s1813_s16 = scalar_lea.vmem %s37_s28, 2048  ;;  %p1818_p4 = scmp.lt.s32.totalorder %s37_s28, %s37_s28 }
   0xd   :  { %p1814_p3 = scmp.ne.s32.totalorder %s37_s28, %s1813_s16  ;;  %p1819_p5 = scmp.lt.s32.totalorder %s1813_s16, %s1813_s16 }
   0xf   :  { %p1820_p6 = por %p1819_p5, %p1818_p4 }
  0x11   :  { %p1821_p7 = pnand %p1820_p6, %p1814_p3 }
  0x13   :  { %1824 = shalt.err (!%p1821_p7)
}
  0x14   :  { %s1947_s17 = smov 128   ;;  %s1948_s18 = smov 8  }
  0x15   :  { %42 = dma.hbm_to_vmem [thread:$0]  %s2304_s1, 2048, %s37_s28, [#allocation8], %s1947_s17, %s1947_s17, %s1948_s18  }
  0x16   :  { %s1825_s23 = scalar_lea.hbm %s2303_s0, 1024 }
  0x17   :  { %p1826_p8 = scmp.ne.s32.totalorder %s2303_s0, %s1825_s23  ;;  %p1829_p9 = scmp.lt.u32.totalorder %s1825_s23, %s2303_s0 }
  0x19   :  { %p1831_p10 = pnand %p1829_p9, %p1826_p8 }
  0x1b   :  { %1834 = shalt.err (!%p1831_p10)
}
  0x1c   :  { %s1835_s29 = scalar_lea.vmem %s2001_s30, 1024  ;;  %p1840_p12 = scmp.lt.s32.totalorder %s2001_s30, %s2001_s30 }
  0x1d   :  { %p1836_p11 = scmp.ne.s32.totalorder %s2001_s30, %s1835_s29  ;;  %p1841_p13 = scmp.lt.s32.totalorder %s1835_s29, %s1835_s29 }
  0x1f   :  { %p1842_p0 = por %p1841_p13, %p1840_p12 }
  0x21   :  { %p1843_p1 = pnand %p1842_p0, %p1836_p11 }
  0x23   :  { %1846 = shalt.err (!%p1843_p1)
}
  0x24   :  { %30 = dma.hbm_to_vmem [thread:$0]  %s2303_s0, 1024, %s2001_s30, [#allocation5], %s1947_s17, %s1947_s17, %s1948_s18  }
  0x25   :  { %s1949_s9 = smov [#allocation9]   ;;  %s1950_s11 = smov [#allocation10]  }
  0x26   :  { %s50_s10 = sshll.u32 %s1949_s9, 4  ;;  %s64_s12 = sshll.u32 %s1950_s11, 4  ;;  %s51_s10 = int_to_ptr.vmem [resolvable:$true] %s50_s10  ;;  %s2038_s12 = int_to_ptr.vmem [resolvable:$true] %s64_s12 }
  0x27   :  { %s1847_s15 = scalar_lea.hbm %s2306_s3, 2048 }
  0x28   :  { %p1848_p2 = scmp.ne.s32.totalorder %s2306_s3, %s1847_s15  ;;  %p1851_p3 = scmp.lt.u32.totalorder %s1847_s15, %s2306_s3 }
  0x2a   :  { %p1853_p4 = pnand %p1851_p3, %p1848_p2 }
  0x2c   :  { %1856 = shalt.err (!%p1853_p4)
}
  0x2d   :  { %s1857_s0 = scalar_lea.vmem %s51_s10, 2048  ;;  %p1862_p6 = scmp.lt.s32.totalorder %s51_s10, %s51_s10 }
  0x2e   :  { %p1858_p5 = scmp.ne.s32.totalorder %s51_s10, %s1857_s0  ;;  %p1863_p7 = scmp.lt.s32.totalorder %s1857_s0, %s1857_s0 }
  0x30   :  { %p1864_p8 = por %p1863_p7, %p1862_p6 }
  0x32   :  { %p1865_p9 = pnand %p1864_p8, %p1858_p5 }
  0x34   :  { %1868 = shalt.err (!%p1865_p9)
}
  0x35   :  { %56 = dma.hbm_to_vmem [thread:$0]  %s2306_s3, 2048, %s51_s10, [#allocation8], %s1947_s17, %s1947_s17, %s1948_s18  }
  0x36   :  { %s1869_s25 = scalar_lea.hbm %s2308_s5, 2048 }
  0x37   :  { %p1870_p10 = scmp.ne.s32.totalorder %s2308_s5, %s1869_s25  ;;  %p1873_p11 = scmp.lt.u32.totalorder %s1869_s25, %s2308_s5 }
  0x39   :  { %p1875_p12 = pnand %p1873_p11, %p1870_p10 }
  0x3b   :  { %1878 = shalt.err (!%p1875_p12)
}
  0x3c   :  { %s1879_s28 = scalar_lea.vmem %s2038_s12, 2048  ;;  %p1884_p0 = scmp.lt.s32.totalorder %s2038_s12, %s2038_s12 }
  0x3d   :  { %p1880_p13 = scmp.ne.s32.totalorder %s2038_s12, %s1879_s28  ;;  %p1885_p1 = scmp.lt.s32.totalorder %s1879_s28, %s1879_s28 }
  0x3f   :  { %p1886_p2 = por %p1885_p1, %p1884_p0 }
  0x41   :  { %p1887_p3 = pnand %p1886_p2, %p1880_p13 }
  0x43   :  { %1890 = shalt.err (!%p1887_p3)
}
  0x44   :  { %70 = dma.hbm_to_vmem [thread:$0]  %s2308_s5, 2048, %s2038_s12, [#allocation11], %s1947_s17, %s1947_s17, %s1948_s18  }
  0x45   :  { %1935 = dma.done.wait [#allocation5], 1024  }
  0x46   :  { %1936 = vsyncadd [#allocation5], 4294966272 }
  0x47   :  { %1937 = dma.done.wait [#allocation8], 4096  }
  0x48   :  { %1938 = vsyncadd [#allocation8], 4294963200 }
  0x49   :  { %1939 = dma.done.wait [#allocation11], 2048  }
  0x4a   :  { %1940 = vsyncadd [#allocation11], 4294965248  ;;  %v1951_v0 = vmov 0.0|0.0   ;;  %vm1952_vm0 = vmmov 0   ;;  %v1953_v1 = vmov 0.0   ;;  %v99_v2 = vld [vmem:[#allocation7] sm:$0xff] }
  0x4b   :  { %1560 = vmatprep.subr.bf16.mxu1 %v1951_v0  ;;  %1245 = vmatprep.mubr.msk.f32.mxu1 %vm1952_vm0, %v1953_v1  ;;  %v100_v3 = vld [vmem:[#allocation7 + $0x8] sm:$0xff]  ;;  %v235_v4 = vld [vmem:[#allocation9] sm:$0xff]  ;;  %v101_v7 = vld [vmem:[#allocation7 + $0x10] sm:$0xff] }
  0x4c   :  { %v1528_v5 = vpack.c.bf16 %v100_v3, %v99_v2  ;;  %v236_v6 = vld [vmem:[#allocation9 + $0x8] sm:$0xff]  ;;  %v102_v8 = vld [vmem:[#allocation7 + $0x18] sm:$0xff]  ;;  %v237_v11 = vld [vmem:[#allocation9 + $0x10] sm:$0xff] }
  0x4d   :  { %v2078_v9 = vpack.c.bf16 %v236_v6, %v235_v4  ;;  %v1532_v10 = vpack.c.bf16 %v102_v8, %v101_v7  ;;  %v238_v12 = vld [vmem:[#allocation9 + $0x18] sm:$0xff]  ;;  %v103_v13 = vld [vmem:[#allocation7 + $0x20] sm:$0xff]  ;;  %v104_v14 = vld [vmem:[#allocation7 + $0x28] sm:$0xff] }
  0x4e   :  { %1529 = vmatprep.subr.bf16.mxu0 %v1528_v5  ;;  %v2081_v15 = vpack.c.bf16 %v238_v12, %v237_v11  ;;  %v1536_v16 = vpack.c.bf16 %v104_v14, %v103_v13  ;;  %v239_v17 = vld [vmem:[#allocation9 + $0x20] sm:$0xff]  ;;  %v240_v18 = vld [vmem:[#allocation9 + $0x28] sm:$0xff]  ;;  %v105_v19 = vld [vmem:[#allocation7 + $0x30] sm:$0xff] }
  0x4f   :  { %1531 = vmatpush3.bf16.msra.mxu0 %v1528_v5  ;;  %1562 = vmatpush3.bf16.msra.mxu1 %v2078_v9  ;;  %v106_v20 = vld [vmem:[#allocation7 + $0x38] sm:$0xff]  ;;  %v2085_v21 = vpack.c.bf16 %v240_v18, %v239_v17  ;;  %v241_v23 = vld [vmem:[#allocation9 + $0x30] sm:$0xff]  ;;  %v107_v25 = vld [vmem:[#allocation7 + $0x40] sm:$0xff] }
  0x50   :  { %1533 = vmatprep.subr.bf16.mxu0 %v1532_v10  ;;  %1563 = vmatprep.subr.bf16.mxu1 %v1951_v0  ;;  %v1540_v22 = vpack.c.bf16 %v106_v20, %v105_v19  ;;  %v242_v24 = vld [vmem:[#allocation9 + $0x38] sm:$0xff]  ;;  %v108_v26 = vld [vmem:[#allocation7 + $0x48] sm:$0xff]  ;;  %v91_v27 = vld [vmem:[#allocation4] sm:$0xff] }
  0x51   :  { %1201 = vmatprep.mubr.f32.mxu0 %v91_v27  ;;  %v2089_v28 = vpack.c.bf16 %v242_v24, %v241_v23  ;;  %v1544_v29 = vpack.c.bf16 %v108_v26, %v107_v25  ;;  %v243_v30 = vld [vmem:[#allocation9 + $0x40] sm:$0xff]  ;;  %v244_v31 = vld [vmem:[#allocation9 + $0x48] sm:$0xff]  ;;  %v109_v32 = vld [vmem:[#allocation7 + $0x50] sm:$0xff] }
  0x52   :  { %v110_v33 = vld [vmem:[#allocation7 + $0x58] sm:$0xff]  ;;  %v2093_v34 = vpack.c.bf16 %v244_v31, %v243_v30  ;;  %v245_v36 = vld [vmem:[#allocation9 + $0x50] sm:$0xff]  ;;  %v111_v38 = vld [vmem:[#allocation7 + $0x60] sm:$0xff] }
  0x53   :  { %1535 = vmatpush3.bf16.msra.mxu0 %v1532_v10  ;;  %1565 = vmatpush3.bf16.msra.mxu1 %v2081_v15  ;;  %v1548_v35 = vpack.c.bf16 %v110_v33, %v109_v32  ;;  %v246_v37 = vld [vmem:[#allocation9 + $0x58] sm:$0xff]  ;;  %v112_v39 = vld [vmem:[#allocation7 + $0x68] sm:$0xff]  ;;  %v247_v42 = vld [vmem:[#allocation9 + $0x60] sm:$0xff] }
  0x54   :  { %1537 = vmatprep.subr.bf16.mxu0 %v1536_v16  ;;  %1566 = vmatprep.subr.bf16.mxu1 %v1951_v0  ;;  %v2097_v40 = vpack.c.bf16 %v246_v37, %v245_v36  ;;  %v1552_v41 = vpack.c.bf16 %v112_v39, %v111_v38  ;;  %v248_v43 = vld [vmem:[#allocation9 + $0x68] sm:$0xff]  ;;  %v113_v44 = vld [vmem:[#allocation7 + $0x70] sm:$0xff]  ;;  %v114_v45 = vld [vmem:[#allocation7 + $0x78] sm:$0xff] }
  0x55   :  { %v2101_v46 = vpack.c.bf16 %v248_v43, %v247_v42  ;;  %v1556_v47 = vpack.c.bf16 %v114_v45, %v113_v44  ;;  %v249_v48 = vld [vmem:[#allocation9 + $0x70] sm:$0xff]  ;;  %v250_v49 = vld [vmem:[#allocation9 + $0x78] sm:$0xff]  ;;  %v92_v51 = vld [vmem:[#allocation4 + $0x8] sm:$0xff] }
  0x56   :  { %v2105_v50 = vpack.c.bf16 %v250_v49, %v249_v48  ;;  %v89_v52 = vld [vmem:[%s2307_s4] sm:$0xff]  ;;  %v93_v53 = vld [vmem:[#allocation4 + $0x10] sm:$0xff]  ;;  %v94_v54 = vld [vmem:[#allocation4 + $0x18] sm:$0xff] }
  0x57   :  { %1539 = vmatpush3.bf16.msra.mxu0 %v1536_v16  ;;  %1568 = vmatpush3.bf16.msra.mxu1 %v2085_v21  ;;  %v95_v55 = vld [vmem:[#allocation4 + $0x20] sm:$0xff]  ;;  %v96_v56 = vld [vmem:[#allocation4 + $0x28] sm:$0xff]  ;;  %v97_v57 = vld [vmem:[#allocation4 + $0x30] sm:$0xff] }
  0x58   :  { %1541 = vmatprep.subr.bf16.mxu0 %v1540_v22  ;;  %1569 = vmatprep.subr.bf16.mxu1 %v1951_v0  ;;  %v98_v58 = vld [vmem:[#allocation4 + $0x38] sm:$0xff]  ;;  %v2153_v59 = vld [vmem:[%s2305_s2] ss:$0 sm:$0xff]  ;;  %v864_v37 = vld [vmem:[#allocation10 + $0x8] sm:$0xff]  ;;  %s1954_s2 = smov [#allocation12]  }
  0x59   :  { %v863_v36 = vld [vmem:[#allocation10] sm:$0xff]  ;;  %v865_v38 = vld [vmem:[#allocation10 + $0x10] sm:$0xff]  ;;  %v868_v43 = vld [vmem:[#allocation10 + $0x28] sm:$0xff]  ;;  %s962_s12 = sshll.u32 %s1954_s2, 4  ;;  %s963_s12 = int_to_ptr.vmem [resolvable:$true] %s962_s12 }
  0x5a   :  { %v1753_v39 = vpack.c.bf16 %v864_v37, %v863_v36  ;;  %v867_v42 = vld [vmem:[#allocation10 + $0x20] sm:$0xff]  ;;  %v869_v45 = vld [vmem:[#allocation10 + $0x30] sm:$0xff]  ;;  %v872_v48 = vld [vmem:[#allocation10 + $0x48] sm:$0xff]  ;;  %s1891_s13 = scalar_lea.vmem %s963_s12, 1024  ;;  %p1896_p5 = scmp.lt.s32.totalorder %s963_s12, %s963_s12 }
  0x5b   :  { %1543 = vmatpush3.bf16.msra.mxu0 %v1540_v22  ;;  %1571 = vmatpush3.bf16.msra.mxu1 %v2089_v28  ;;  %v1759_v44 = vpack.c.bf16 %v868_v43, %v867_v42  ;;  %p1892_p4 = scmp.ne.s32.totalorder %s963_s12, %s1891_s13  ;;  %p1897_p6 = scmp.lt.s32.totalorder %s1891_s13, %s1891_s13 }
  0x5c   :  { %1545 = vmatprep.subr.bf16.mxu0 %v1544_v29  ;;  %1572 = vmatprep.subr.bf16.mxu1 %v1951_v0 }
  0x5d   :  { %p1898_p7 = por %p1897_p6, %p1896_p5 }
  0x5f   :  { %1547 = vmatpush3.bf16.msra.mxu0 %v1544_v29  ;;  %1574 = vmatpush3.bf16.msra.mxu1 %v2093_v34  ;;  %p1899_p8 = pnand %p1898_p7, %p1892_p4 }
  0x60   :  { %1549 = vmatprep.subr.bf16.mxu0 %v1548_v35  ;;  %1575 = vmatprep.subr.bf16.mxu1 %v1951_v0 }
  0x63   :  { %1551 = vmatpush3.bf16.msra.mxu0 %v1548_v35  ;;  %1577 = vmatpush3.bf16.msra.mxu1 %v2097_v40 }
  0x64   :  { %1553 = vmatprep.subr.bf16.mxu0 %v1552_v41  ;;  %1578 = vmatprep.subr.bf16.mxu1 %v1951_v0 }
  0x67   :  { %1555 = vmatpush3.bf16.msra.mxu0 %v1552_v41  ;;  %1580 = vmatpush3.bf16.msra.mxu1 %v2101_v46 }
  0x68   :  { %1557 = vmatprep.subr.bf16.mxu0 %v1556_v47  ;;  %1581 = vmatprep.subr.bf16.mxu1 %v1951_v0 }
  0x6b   :  { %1559 = vmatpush3.bf16.msra.mxu0 %v1556_v47  ;;  %1583 = vmatpush3.bf16.msra.mxu1 %v2105_v50 }
  0x6c   :  { %1584 = vmatprep.subr.bf16.mxu0 %v1951_v0  ;;  %1608 = vmatprep.subr.bf16.mxu1 %v1951_v0 }
  0x6e   :  { %1202 = vmatmul.mubr.f32.vlgmr.msra.gmra.mrb[0].mxu0 %v92_v51  ;;  %1246 = vmatmul.mubr.f32.vlgmr.msra.gmra.mrb[0].mxu1 %v89_v52 }
  0x6f   :  { %1586 = vmatpush3.bf16.msra.mxu0 %v2078_v9  ;;  %1610 = vmatpush3.bf16.msra.mxu1 %v2078_v9 }
  0x70   :  { %1587 = vmatprep.subr.bf16.mxu0 %v1951_v0  ;;  %1611 = vmatprep.subr.bf16.mxu1 %v1951_v0 }
  0x71   :  { %1315 = vmatprep.mubr.msk.f32.mxu1 %vm1952_vm0, %v1953_v1  ;;  %1204 = vmatprep.mubr.f32.mxu0 %v93_v53 }
  0x72   :  { %1205 = vmatmul.mubr.f32.gmra.mrb[2].mxu0 %v94_v54 }
  0x73   :  { %1589 = vmatpush3.bf16.msra.mxu0 %v2081_v15  ;;  %1613 = vmatpush3.bf16.msra.mxu1 %v2081_v15 }
  0x74   :  { %1590 = vmatprep.subr.bf16.mxu0 %v1951_v0  ;;  %1614 = vmatprep.subr.bf16.mxu1 %v1951_v0 }
  0x75   :  { %1207 = vmatprep.mubr.f32.mxu0 %v95_v55  ;;  %v873_v55 = vld [vmem:[#allocation10 + $0x50] sm:$0xff] }
  0x76   :  { %1208 = vmatmul.mubr.f32.gmra.mrb[4].mxu0 %v96_v56  ;;  %v874_v56 = vld [vmem:[#allocation10 + $0x58] sm:$0xff] }
  0x77   :  { %1592 = vmatpush3.bf16.msra.mxu0 %v2085_v21  ;;  %1616 = vmatpush3.bf16.msra.mxu1 %v2085_v21 }
  0x78   :  { %1593 = vmatprep.subr.bf16.mxu0 %v1951_v0  ;;  %1617 = vmatprep.subr.bf16.mxu1 %v1951_v0 }
  0x79   :  { %1210 = vmatprep.mubr.f32.mxu0 %v97_v57  ;;  %v1768_v57 = vpack.c.bf16 %v874_v56, %v873_v55 }
  0x7a   :  { %1211 = vmatmul.mubr.f32.gmra.mrb[6].mxu0 %v98_v58  ;;  %v875_v58 = vld [vmem:[#allocation10 + $0x60] sm:$0xff] }
  0x7b   :  { %1595 = vmatpush3.bf16.msra.mxu0 %v2089_v28  ;;  %1619 = vmatpush3.bf16.msra.mxu1 %v2089_v28 }
  0x7c   :  { %1596 = vmatprep.subr.bf16.mxu0 %v1951_v0  ;;  %1620 = vmatprep.subr.bf16.mxu1 %v1951_v0 }
  0x7d   :  { %1280 = vmatprep.mubr.msk.f32.mxu0 %vm1952_vm0, %v1953_v1 }
  0x7f   :  { %1598 = vmatpush3.bf16.msra.mxu0 %v2093_v34  ;;  %1622 = vmatpush3.bf16.msra.mxu1 %v2093_v34 }
  0x80   :  { %1599 = vmatprep.subr.bf16.mxu0 %v1951_v0  ;;  %1623 = vmatprep.subr.bf16.mxu1 %v1951_v0 }
  0x83   :  { %1601 = vmatpush3.bf16.msra.mxu0 %v2097_v40  ;;  %1625 = vmatpush3.bf16.msra.mxu1 %v2097_v40 }
  0x84   :  { %1602 = vmatprep.subr.bf16.mxu0 %v1951_v0  ;;  %1626 = vmatprep.subr.bf16.mxu1 %v1951_v0 }
  0x87   :  { %1604 = vmatpush3.bf16.msra.mxu0 %v2101_v46  ;;  %1628 = vmatpush3.bf16.msra.mxu1 %v2101_v46 }
  0x88   :  { %1605 = vmatprep.subr.bf16.mxu0 %v1951_v0  ;;  %1629 = vmatprep.subr.bf16.mxu1 %v1951_v0 }
  0x8b   :  { %1607 = vmatpush3.bf16.msra.mxu0 %v2105_v50  ;;  %1631 = vmatpush3.bf16.msra.mxu1 %v2105_v50 }
  0x8c   :  { %1632 = vmatprep.subr.bf16.mxu0 %v1951_v0  ;;  %1656 = vmatprep.subr.bf16.mxu1 %v1951_v0 }
 0x141   :  { %v1203_v60 = vpop.f32.mrb[0].mxu0  ;;  %v319_v61 = vpop.f32.mrb[0].mxu1 }
 0x142   :  { %v188_v62 = vpop.f32.mrb[1].mxu0  ;;  %v1247_v63 = vpop.f32.mrb[1].mxu1  ;;  %v194_v12 = vadd.f32 %v1203_v60, %v2153_v59  ;;  %v876_v60 = vld [vmem:[#allocation10 + $0x68] sm:$0xff] }
 0x143   :  { %v189_v2 = vadd.f32 %v2153_v59, %v188_v62  ;;  %v877_v62 = vld [vmem:[#allocation10 + $0x70] sm:$0xff]  ;;  %v878_v63 = vld [vmem:[#allocation10 + $0x78] sm:$0xff] }
 0x145   :  { %v323_v3 = vadd.f32 %v319_v61, %v189_v2  ;;  %v1206_v5 = vpop.f32.mrb[2].mxu0  ;;  %v1771_v61 = vpack.c.bf16 %v876_v60, %v875_v58  ;;  %v1774_v2 = vpack.c.bf16 %v878_v63, %v877_v62 }
 0x146   :  { %v198_v6 = vpop.f32.mrb[3].mxu0  ;;  %v204_v24 = vadd.f32 %v1206_v5, %v2153_v59 }
 0x147   :  { %1787 = vtanh.f32 %v323_v3  ;;  %v199_v18 = vadd.f32 %v2153_v59, %v198_v6 }
 0x149   :  { %v2174_v7 = vpop.f32.mrb[4].mxu0 }
 0x14a   :  { %v2176_v8 = vpop.f32.mrb[5].mxu0 }
 0x14b   :  { %v209_v30 = vadd.f32 %v2153_v59, %v2176_v8 }
 0x14d   :  { %v2178_v10 = vpop.f32.mrb[6].mxu0 }
 0x14e   :  { %v2180_v11 = vpop.f32.mrb[7].mxu0  ;;  %v224_v3 = vadd.f32 %v2178_v10, %v2153_v59 }
 0x151   :  { %v1788_v4 = vpop.eup %1787 }
 0x152   :  { %325 = vst [vmem:[#allocation12] sm:$0xff] %v1788_v4  ;;  %1281 = vmatmul.mubr.f32.vlgmr.msra.gmra.mrb[8].mxu0 %v1788_v4 }
 0x153   :  { %1634 = vmatpush3.bf16.msra.mxu0 %v2078_v9  ;;  %1350 = vmatprep.mubr.msk.f32.mxu0 %vm1952_vm0, %v1953_v1 }
 0x154   :  { %1635 = vmatprep.subr.bf16.mxu0 %v1951_v0 }
 0x157   :  { %1637 = vmatpush3.bf16.msra.mxu0 %v2081_v15 }
 0x158   :  { %1638 = vmatprep.subr.bf16.mxu0 %v1951_v0 }
 0x15b   :  { %1640 = vmatpush3.bf16.msra.mxu0 %v2085_v21 }
 0x15c   :  { %1641 = vmatprep.subr.bf16.mxu0 %v1951_v0 }
 0x15f   :  { %1643 = vmatpush3.bf16.msra.mxu0 %v2089_v28 }
 0x160   :  { %1644 = vmatprep.subr.bf16.mxu0 %v1951_v0 }
 0x163   :  { %1646 = vmatpush3.bf16.msra.mxu0 %v2093_v34 }
 0x164   :  { %1647 = vmatprep.subr.bf16.mxu0 %v1951_v0 }
 0x167   :  { %1649 = vmatpush3.bf16.msra.mxu0 %v2097_v40 }
 0x168   :  { %1650 = vmatprep.subr.bf16.mxu0 %v1951_v0 }
 0x16b   :  { %1652 = vmatpush3.bf16.msra.mxu0 %v2101_v46 }
 0x16c   :  { %1653 = vmatprep.subr.bf16.mxu0 %v1951_v0 }
 0x16f   :  { %1655 = vmatpush3.bf16.msra.mxu0 %v2105_v50 }
 0x170   :  { %1680 = vmatprep.subr.bf16.mxu0 %v1951_v0 }
 0x225   :  { %v394_v13 = vpop.f32.mrb[8].mxu0 }
 0x226   :  { %v398_v14 = vadd.f32 %v394_v13, %v194_v12  ;;  %v1282_v16 = vpop.f32.mrb[9].mxu0 }
 0x228   :  { %1789 = vtanh.f32 %v398_v14 }
 0x232   :  { %v1790_v17 = vpop.eup %1789 }
 0x233   :  { %401 = vst [vmem:[#allocation12 + $0x8] sm:$0xff] %v1790_v17  ;;  %1316 = vmatmul.mubr.f32.vlgmr.msra.gmra.mrb[2].mxu1 %v1790_v17 }
 0x234   :  { %1658 = vmatpush3.bf16.msra.mxu1 %v2078_v9  ;;  %1385 = vmatprep.mubr.msk.f32.mxu1 %vm1952_vm0, %v1953_v1 }
 0x235   :  { %1659 = vmatprep.subr.bf16.mxu1 %v1951_v0 }
 0x238   :  { %1661 = vmatpush3.bf16.msra.mxu1 %v2081_v15 }
 0x239   :  { %1662 = vmatprep.subr.bf16.mxu1 %v1951_v0 }
 0x23c   :  { %1664 = vmatpush3.bf16.msra.mxu1 %v2085_v21 }
 0x23d   :  { %1665 = vmatprep.subr.bf16.mxu1 %v1951_v0 }
 0x240   :  { %1667 = vmatpush3.bf16.msra.mxu1 %v2089_v28 }
 0x241   :  { %1668 = vmatprep.subr.bf16.mxu1 %v1951_v0 }
 0x244   :  { %1670 = vmatpush3.bf16.msra.mxu1 %v2093_v34 }
 0x245   :  { %1671 = vmatprep.subr.bf16.mxu1 %v1951_v0 }
 0x248   :  { %1673 = vmatpush3.bf16.msra.mxu1 %v2097_v40 }
 0x249   :  { %1674 = vmatprep.subr.bf16.mxu1 %v1951_v0 }
 0x24c   :  { %1676 = vmatpush3.bf16.msra.mxu1 %v2101_v46 }
 0x24d   :  { %1677 = vmatprep.subr.bf16.mxu1 %v1951_v0 }
 0x250   :  { %1679 = vmatpush3.bf16.msra.mxu1 %v2105_v50 }
 0x251   :  { %1704 = vmatprep.subr.bf16.mxu1 %v1951_v0 }
 0x306   :  { %v470_v19 = vpop.f32.mrb[2].mxu1 }
 0x307   :  { %v474_v20 = vadd.f32 %v470_v19, %v199_v18  ;;  %v1317_v22 = vpop.f32.mrb[3].mxu1 }
 0x309   :  { %1791 = vtanh.f32 %v474_v20 }
 0x313   :  { %v1792_v23 = vpop.eup %1791 }
 0x314   :  { %477 = vst [vmem:[#allocation12 + $0x10] sm:$0xff] %v1792_v23  ;;  %1351 = vmatmul.mubr.f32.vlgmr.msra.gmra.mrb[10].mxu0 %v1792_v23 }
 0x315   :  { %1682 = vmatpush3.bf16.msra.mxu0 %v2078_v9  ;;  %1420 = vmatprep.mubr.msk.f32.mxu0 %vm1952_vm0, %v1953_v1 }
 0x316   :  { %1683 = vmatprep.subr.bf16.mxu0 %v1951_v0 }
 0x319   :  { %1685 = vmatpush3.bf16.msra.mxu0 %v2081_v15 }
 0x31a   :  { %1686 = vmatprep.subr.bf16.mxu0 %v1951_v0 }
 0x31d   :  { %1688 = vmatpush3.bf16.msra.mxu0 %v2085_v21 }
 0x31e   :  { %1689 = vmatprep.subr.bf16.mxu0 %v1951_v0 }
 0x321   :  { %1691 = vmatpush3.bf16.msra.mxu0 %v2089_v28 }
 0x322   :  { %1692 = vmatprep.subr.bf16.mxu0 %v1951_v0 }
 0x325   :  { %1694 = vmatpush3.bf16.msra.mxu0 %v2093_v34 }
 0x326   :  { %1695 = vmatprep.subr.bf16.mxu0 %v1951_v0 }
 0x329   :  { %1697 = vmatpush3.bf16.msra.mxu0 %v2097_v40 }
 0x32a   :  { %1698 = vmatprep.subr.bf16.mxu0 %v1951_v0 }
 0x32d   :  { %1700 = vmatpush3.bf16.msra.mxu0 %v2101_v46 }
 0x32e   :  { %1701 = vmatprep.subr.bf16.mxu0 %v1951_v0 }
 0x331   :  { %1703 = vmatpush3.bf16.msra.mxu0 %v2105_v50 }
 0x332   :  { %1728 = vmatprep.subr.bf16.mxu0 %v1951_v0 }
 0x3e7   :  { %v546_v25 = vpop.f32.mrb[10].mxu0 }
 0x3e8   :  { %v550_v26 = vadd.f32 %v546_v25, %v204_v24  ;;  %v1352_v27 = vpop.f32.mrb[11].mxu0 }
 0x3ea   :  { %1793 = vtanh.f32 %v550_v26 }
 0x3f4   :  { %v1794_v29 = vpop.eup %1793 }
 0x3f5   :  { %553 = vst [vmem:[#allocation12 + $0x18] sm:$0xff] %v1794_v29  ;;  %1386 = vmatmul.mubr.f32.vlgmr.msra.gmra.mrb[4].mxu1 %v1794_v29 }
 0x3f6   :  { %1706 = vmatpush3.bf16.msra.mxu1 %v2078_v9  ;;  %1455 = vmatprep.mubr.msk.f32.mxu1 %vm1952_vm0, %v1953_v1 }
 0x3f7   :  { %1707 = vmatprep.subr.bf16.mxu1 %v1951_v0 }
 0x3fa   :  { %1709 = vmatpush3.bf16.msra.mxu1 %v2081_v15 }
 0x3fb   :  { %1710 = vmatprep.subr.bf16.mxu1 %v1951_v0 }
 0x3fe   :  { %1712 = vmatpush3.bf16.msra.mxu1 %v2085_v21 }
 0x3ff   :  { %1713 = vmatprep.subr.bf16.mxu1 %v1951_v0 }
 0x402   :  { %1715 = vmatpush3.bf16.msra.mxu1 %v2089_v28 }
 0x403   :  { %1716 = vmatprep.subr.bf16.mxu1 %v1951_v0 }
 0x406   :  { %1718 = vmatpush3.bf16.msra.mxu1 %v2093_v34 }
 0x407   :  { %1719 = vmatprep.subr.bf16.mxu1 %v1951_v0 }
 0x40a   :  { %1721 = vmatpush3.bf16.msra.mxu1 %v2097_v40 }
 0x40b   :  { %1722 = vmatprep.subr.bf16.mxu1 %v1951_v0 }
 0x40e   :  { %1724 = vmatpush3.bf16.msra.mxu1 %v2101_v46 }
 0x40f   :  { %1725 = vmatprep.subr.bf16.mxu1 %v1951_v0 }
 0x412   :  { %1727 = vmatpush3.bf16.msra.mxu1 %v2105_v50 }
 0x413   :  { %1752 = vmatprep.subr.bf16.mxu1 %v1951_v0 }
 0x4c8   :  { %v622_v31 = vpop.f32.mrb[4].mxu1 }
 0x4c9   :  { %v626_v32 = vadd.f32 %v622_v31, %v209_v30  ;;  %v1387_v33 = vpop.f32.mrb[5].mxu1 }
 0x4cb   :  { %1795 = vtanh.f32 %v626_v32 }
 0x4d5   :  { %v1796_v35 = vpop.eup %1795 }
 0x4d6   :  { %629 = vst [vmem:[#allocation12 + $0x20] sm:$0xff] %v1796_v35  ;;  %1421 = vmatmul.mubr.f32.vlgmr.msra.gmra.mrb[12].mxu0 %v1796_v35 }
 0x4d7   :  { %1730 = vmatpush3.bf16.msra.mxu0 %v2078_v9  ;;  %1490 = vmatprep.mubr.msk.f32.mxu0 %vm1952_vm0, %v1953_v1  ;;  %v214_v9 = vadd.f32 %v2174_v7, %v2153_v59 }
 0x4d8   :  { %1731 = vmatprep.subr.bf16.mxu0 %v1951_v0 }
 0x4db   :  { %1733 = vmatpush3.bf16.msra.mxu0 %v2081_v15 }
 0x4dc   :  { %1734 = vmatprep.subr.bf16.mxu0 %v1951_v0 }
 0x4df   :  { %1736 = vmatpush3.bf16.msra.mxu0 %v2085_v21 }
 0x4e0   :  { %1737 = vmatprep.subr.bf16.mxu0 %v1951_v0 }
 0x4e3   :  { %1739 = vmatpush3.bf16.msra.mxu0 %v2089_v28 }
 0x4e4   :  { %1740 = vmatprep.subr.bf16.mxu0 %v1951_v0 }
 0x4e7   :  { %1742 = vmatpush3.bf16.msra.mxu0 %v2093_v34 }
 0x4e8   :  { %1743 = vmatprep.subr.bf16.mxu0 %v1951_v0 }
 0x4eb   :  { %1745 = vmatpush3.bf16.msra.mxu0 %v2097_v40  ;;  %v866_v40 = vld [vmem:[#allocation10 + $0x18] sm:$0xff] }
 0x4ec   :  { %1746 = vmatprep.subr.bf16.mxu0 %v1951_v0  ;;  %v1756_v41 = vpack.c.bf16 %v866_v40, %v865_v38 }
 0x4ef   :  { %1748 = vmatpush3.bf16.msra.mxu0 %v2101_v46  ;;  %v870_v46 = vld [vmem:[#allocation10 + $0x38] sm:$0xff] }
 0x4f0   :  { %1749 = vmatprep.subr.bf16.mxu0 %v1951_v0  ;;  %v1762_v47 = vpack.c.bf16 %v870_v46, %v869_v45 }
 0x4f3   :  { %1751 = vmatpush3.bf16.msra.mxu0 %v2105_v50  ;;  %v219_v50 = vadd.f32 %v2153_v59, %v2180_v11 }
 0x5a9   :  { %v698_v15 = vpop.f32.mrb[12].mxu0 }
 0x5aa   :  { %v702_v21 = vadd.f32 %v698_v15, %v214_v9  ;;  %v1422_v28 = vpop.f32.mrb[13].mxu0 }
 0x5ac   :  { %1797 = vtanh.f32 %v702_v21 }
 0x5b6   :  { %v1798_v34 = vpop.eup %1797 }
 0x5b7   :  { %705 = vst [vmem:[#allocation12 + $0x28] sm:$0xff] %v1798_v34  ;;  %1456 = vmatmul.mubr.f32.vlgmr.msra.gmra.mrb[6].mxu1 %v1798_v34 }
 0x5b8   :  { %1525 = vmatprep.mubr.msk.f32.mxu1 %vm1952_vm0, %v1953_v1  ;;  %1754 = vmatpush3.bf16.msra.mxu1 %v1753_v39  ;;  %v871_v1 = vld [vmem:[#allocation10 + $0x40] sm:$0xff] }
 0x5b9   :  { %1755 = vmatprep.subr.bf16.mxu1 %v1951_v0  ;;  %v1765_v49 = vpack.c.bf16 %v872_v48, %v871_v1 }
 0x5bc   :  { %1757 = vmatpush3.bf16.msra.mxu1 %v1756_v41 }
 0x5bd   :  { %1758 = vmatprep.subr.bf16.mxu1 %v1951_v0 }
 0x5c0   :  { %1760 = vmatpush3.bf16.msra.mxu1 %v1759_v44 }
 0x5c1   :  { %1761 = vmatprep.subr.bf16.mxu1 %v1951_v0 }
 0x5c4   :  { %1763 = vmatpush3.bf16.msra.mxu1 %v1762_v47 }
 0x5c5   :  { %1764 = vmatprep.subr.bf16.mxu1 %v1951_v0 }
 0x5c8   :  { %1766 = vmatpush3.bf16.msra.mxu1 %v1765_v49 }
 0x5c9   :  { %1767 = vmatprep.subr.bf16.mxu1 %v1951_v0 }
 0x5cc   :  { %1769 = vmatpush3.bf16.msra.mxu1 %v1768_v57 }
 0x5cd   :  { %1770 = vmatprep.subr.bf16.mxu1 %v1951_v0 }
 0x5d0   :  { %1772 = vmatpush3.bf16.msra.mxu1 %v1771_v61 }
 0x5d1   :  { %1773 = vmatprep.subr.bf16.mxu1 %v1951_v0 }
 0x5d4   :  { %1775 = vmatpush3.bf16.msra.mxu1 %v1774_v2 }
 0x68a   :  { %v774_v51 = vpop.f32.mrb[6].mxu1 }
 0x68b   :  { %v778_v52 = vadd.f32 %v774_v51, %v219_v50  ;;  %v1457_v53 = vpop.f32.mrb[7].mxu1 }
 0x68d   :  { %1799 = vtanh.f32 %v778_v52 }
 0x697   :  { %v1800_v54 = vpop.eup %1799 }
 0x698   :  { %781 = vst [vmem:[#allocation12 + $0x30] sm:$0xff] %v1800_v54  ;;  %1491 = vmatmul.mubr.f32.vlgmr.msra.gmra.mrb[14].mxu0 %v1800_v54 }
 0x76b   :  { %v850_v4 = vpop.f32.mrb[14].mxu0 }
 0x76c   :  { %v854_v5 = vadd.f32 %v850_v4, %v224_v3  ;;  %v1492_v6 = vpop.f32.mrb[15].mxu0 }
 0x76e   :  { %1801 = vtanh.f32 %v854_v5 }
 0x778   :  { %v1802_v7 = vpop.eup %1801 }
 0x779   :  { %857 = vst [vmem:[#allocation12 + $0x38] sm:$0xff] %v1802_v7  ;;  %1526 = vmatmul.mubr.f32.vlgmr.msra.gmra.mrb[8].mxu1 %v1802_v7 }
 0x77a   :  { %1902 = shalt.err (!%p1899_p8)
}
 0x77b   :  { %s1903_s16 = scalar_lea.hbm %s2310_s7, 1024 }
 0x77c   :  { %p1904_p9 = scmp.ne.s32.totalorder %s2310_s7, %s1903_s16  ;;  %p1907_p10 = scmp.lt.u32.totalorder %s1903_s16, %s2310_s7 }
 0x77e   :  { %p1909_p11 = pnand %p1907_p10, %p1904_p9 }
 0x780   :  { %1912 = shalt.err (!%p1909_p11)
}
 0x781   :  { %968 = dma.vmem_to_hbm [thread:$0]  %s963_s12, 1024, %s2310_s7, [#allocation6], %s1947_s17, %s1947_s17, %s1948_s18  }
 0x782   :  { %v991_v0 = vld [vmem:[%s2309_s6] ss:$0 sm:$0xff]  ;;  %s1955_s25 = smov [#allocation13]  }
 0x783   :  { %s975_s26 = sshll.u32 %s1955_s25, 4  ;;  %s976_s26 = int_to_ptr.vmem [resolvable:$true] %s975_s26 }
 0x784   :  { %s1913_s27 = scalar_lea.vmem %s976_s26, 128  ;;  %p1918_p13 = scmp.lt.s32.totalorder %s976_s26, %s976_s26 }
 0x785   :  { %p1914_p12 = scmp.ne.s32.totalorder %s976_s26, %s1913_s27  ;;  %p1919_p0 = scmp.lt.s32.totalorder %s1913_s27, %s1913_s27 }
 0x787   :  { %p1920_p1 = por %p1919_p0, %p1918_p13 }
 0x789   :  { %p1921_p2 = pnand %p1920_p1, %p1914_p12 }
 0x84c   :  { %v952_v59 = vpop.f32.mrb[8].mxu1 }
 0x84d   :  { %v953_v8 = vadd.f32 %v991_v0, %v952_v59  ;;  %v1527_v10 = vpop.f32.mrb[9].mxu1 }
 0x84f   :  { %956 = vst [vmem:[#allocation13] sm:$0xff] %v953_v8 }
 0x850   :  { %1924 = shalt.err (!%p1921_p2)
}
 0x851   :  { %s1925_s17 = scalar_lea.hbm %s2311_s8, 128 }
 0x852   :  { %p1926_p3 = scmp.ne.s32.totalorder %s2311_s8, %s1925_s17  ;;  %p1929_p4 = scmp.lt.u32.totalorder %s1925_s17, %s2311_s8 }
 0x854   :  { %p1931_p5 = pnand %p1929_p4, %p1926_p3 }
 0x856   :  { %1934 = shalt.err (!%p1931_p5)
}
 0x857   :  { %978 = dma.vmem_to_hbm [thread:$0]  %s976_s26, 128, %s2311_s8, [#allocation14]  }
 0x858   :  { %1941 = dma.done.wait [#allocation6], 1024  }
 0x859   :  { %1942 = vsyncadd [#allocation6], 4294966272 }
 0x85a   :  { %1943 = dma.done.wait [#allocation14], 128  }
 0x85b   :  { %1944 = vsyncadd [#allocation14], 4294967168 }
 0x85c   :  { %985 = vsyncpa [#allocation5], 1 }
 0x85d   :  { %986 = vsyncpa [#allocation8], 1 }
 0x85e   :  { %987 = vsyncpa [#allocation11], 1 }
 0x85f   :  { %988 = vsyncpa [#allocation6], 1 }
 0x860   :  { %989 = vsyncpa [#allocation14], 1 }

</bundles_post_ra>
